<compile_context>
chip_gen: v6e
topology: v6e:2x2x1
jax: 0.10.0
libtpu: 0.0.40
codegen_flags: <defaults>
</compile_context>

<pallas_src>
import functools

import jax
import jax.numpy as jnp
from jax import lax
from jax.experimental import pallas as pl
from jax.experimental.pallas import tpu as pltpu


def _round_up(x, m):
    return (x + m - 1) // m * m


# ------------------------------------------------------------------
# Fused matmul (+bias) + (residual) + (ReLU) kernel; BN scale pre-folded into weights
# ------------------------------------------------------------------
def _mm_bias_act_kernel(x_ref, w_ref, b_ref, *rest, relu, has_res):
    if has_res:
        res_ref, o_ref, acc_ref = rest
    else:
        o_ref, acc_ref = rest
    k = pl.program_id(2)

    @pl.when(k == 0)
    def _():
        acc_ref[...] = jnp.zeros_like(acc_ref)

    acc_ref[...] += jnp.dot(x_ref[...], w_ref[...],
                            preferred_element_type=jnp.float32)

    @pl.when(k == pl.num_programs(2) - 1)
    def _():
        y = acc_ref[...] + b_ref[...]
        if has_res:
            y = y + res_ref[...].astype(jnp.float32)
        if relu:
            y = jnp.maximum(y, 0.0)
        o_ref[...] = y.astype(o_ref.dtype)


def _pallas_matmul_bn_act(x, w, scale, bias, *, relu, residual=None,
                          out_dtype=jnp.bfloat16):
    """out = act((x @ (w*scale)) + bias [+ residual]); bf16 operands, f32 accumulation."""
    M, K = x.shape
    _, N = w.shape
    bm = min(512, _round_up(M, 8))
    bn = min(256, _round_up(N, 128))
    bk = min(512, _round_up(K, 128))
    Mp, Kp, Np = _round_up(M, bm), _round_up(K, bk), _round_up(N, bn)

    xp = x.astype(jnp.bfloat16)
    if (Mp, Kp) != (M, K):
        xp = jnp.pad(xp, ((0, Mp - M), (0, Kp - K)))
    # Fold the per-output-channel BN scale into the weight before the bf16 cast.
    wp = (w.astype(jnp.float32) * scale.astype(jnp.float32)[None, :]).astype(jnp.bfloat16)
    if (Kp, Np) != (K, N):
        wp = jnp.pad(wp, ((0, Kp - K), (0, Np - N)))
    bp = jnp.pad(bias.astype(jnp.float32).reshape(1, N), ((0, 0), (0, Np - N)))

    has_res = residual is not None
    in_specs = [
        pl.BlockSpec((bm, bk), lambda i, j, k: (i, k)),
        pl.BlockSpec((bk, bn), lambda i, j, k: (k, j)),
        pl.BlockSpec((1, bn), lambda i, j, k: (0, j)),
    ]
    args = [xp, wp, bp]
    if has_res:
        rp = residual.astype(jnp.bfloat16)
        if (Mp, Np) != (M, N):
            rp = jnp.pad(rp, ((0, Mp - M), (0, Np - N)))
        in_specs.append(pl.BlockSpec((bm, bn), lambda i, j, k: (i, j)))
        args.append(rp)

    out = pl.pallas_call(
        functools.partial(_mm_bias_act_kernel, relu=relu, has_res=has_res),
        out_shape=jax.ShapeDtypeStruct((Mp, Np), out_dtype),
        grid_spec=pltpu.PrefetchScalarGridSpec(
            num_scalar_prefetch=0,
            grid=(Mp // bm, Np // bn, Kp // bk),
            in_specs=in_specs,
            out_specs=pl.BlockSpec((bm, bn), lambda i, j, k: (i, j)),
            scratch_shapes=[pltpu.VMEM((bm, bn), jnp.float32)],
        ),
        compiler_params=pltpu.CompilerParams(
            dimension_semantics=("parallel", "parallel", "arbitrary")),
    )(*args)
    if (Mp, Np) != (M, N):
        out = out[:M, :N]
    return out


# ------------------------------------------------------------------
# Conv3d (+BN +residual +ReLU) via (im2col when needed) + fused matmul
# ------------------------------------------------------------------
@functools.partial(jax.jit, static_argnames=("stride", "padding", "relu", "out_dtype"))
def conv3d_bn_act(x, w, scale, bias, *, stride, padding, relu, residual=None,
                  out_dtype=jnp.bfloat16):
    """x: (N,T,H,W,Cin) channels-last; w: PyTorch Conv3d weight (Cout,Cin,kT,kH,kW)."""
    N, T, H, W, Cin = x.shape
    Cout, _, kT, kH, kW = w.shape
    st, sh, sw = stride
    pt, ph, pw = padding
    To = (T + 2 * pt - kT) // st + 1
    Ho = (H + 2 * ph - kH) // sh + 1
    Wo = (W + 2 * pw - kW) // sw + 1

    if (kT, kH, kW) == (1, 1, 1) and (pt, ph, pw) == (0, 0, 0):
        # 1x1x1 conv: no im2col, pure reshape (strided slice only if strided).
        if (st, sh, sw) == (1, 1, 1):
            patches = x.reshape(-1, Cin)
        else:
            patches = x[:, ::st, ::sh, ::sw, :].reshape(-1, Cin)
    else:
        xp = jnp.pad(x, ((0, 0), (pt, pt), (ph, ph), (pw, pw), (0, 0)))
        cols = []
        for dt in range(kT):
            for dh in range(kH):
                for dw in range(kW):
                    cols.append(xp[:, dt:dt + st * (To - 1) + 1:st,
                                   dh:dh + sh * (Ho - 1) + 1:sh,
                                   dw:dw + sw * (Wo - 1) + 1:sw, :])
        patches = jnp.concatenate(cols, axis=-1).reshape(-1, kT * kH * kW * Cin)

    wm = jnp.transpose(w, (2, 3, 4, 1, 0)).reshape(kT * kH * kW * Cin, Cout)
    res2d = None if residual is None else residual.reshape(-1, Cout)
    out = _pallas_matmul_bn_act(patches, wm, scale, bias, relu=relu,
                                residual=res2d, out_dtype=out_dtype)
    return out.reshape(N, To, Ho, Wo, Cout)


# ------------------------------------------------------------------
# MaxPool3d (padding 0)
# ------------------------------------------------------------------
def _window_max_kernel(x_ref, o_ref, *, taps):
    m = x_ref[0].astype(jnp.float32)
    for t in range(1, taps):
        m = jnp.maximum(m, x_ref[t].astype(jnp.float32))
    o_ref[...] = m.astype(o_ref.dtype)


@functools.partial(jax.jit, static_argnames=("kernel", "stride"))
def maxpool3d(x, *, kernel, stride):
    """MaxPool3d, padding 0. x: (N, T, H, W, C) bf16."""
    N, T, H, W, C = x.shape
    kt, kh, kw = kernel
    st, sh, sw = stride
    To = (T - kt) // st + 1
    Ho = (H - kh) // sh + 1
    Wo = (W - kw) // sw + 1
    cols = []
    for dt in range(kt):
        for dh in range(kh):
            for dw in range(kw):
                cols.append(x[:, dt:dt + st * (To - 1) + 1:st,
                              dh:dh + sh * (Ho - 1) + 1:sh,
                              dw:dw + sw * (Wo - 1) + 1:sw, :])
    stack = jnp.stack(cols, axis=0).reshape(len(cols), -1, C)
    Kw, M, _ = stack.shape
    bm = min(512, _round_up(M, 8))
    Mp = _round_up(M, bm)
    if Mp != M:
        stack = jnp.pad(stack, ((0, 0), (0, Mp - M), (0, 0)))
    out = pl.pallas_call(
        functools.partial(_window_max_kernel, taps=Kw),
        out_shape=jax.ShapeDtypeStruct((Mp, C), x.dtype),
        grid=(Mp // bm,),
        in_specs=[pl.BlockSpec((Kw, bm, C), lambda i: (0, i, 0))],
        out_specs=pl.BlockSpec((bm, C), lambda i: (i, 0)),
        compiler_params=pltpu.CompilerParams(dimension_semantics=("parallel",)),
    )(stack)
    return out[:M].reshape(N, To, Ho, Wo, C)


# ------------------------------------------------------------------
# Fused global average pool + final 1x1x1 "fullyconv" (matmul + bias)
# ------------------------------------------------------------------
def _pool_fc_kernel(x_ref, w_ref, b_ref, o_ref):
    xm = jnp.mean(x_ref[...].astype(jnp.float32), axis=0, keepdims=True)   # (1, C)
    o_ref[...] = jnp.dot(xm.astype(jnp.bfloat16), w_ref[...],
                         preferred_element_type=jnp.float32) + b_ref[...]


@jax.jit
def avgpool_fullyconv(x, w, b):
    """x: (N, L, C); w: PyTorch Conv3d weight (num_class, C, 1, 1, 1); b: (num_class,).

    Computes mean over L followed by the 1x1x1 conv (a C -> num_class matmul + bias)
    in a single Pallas kernel.  Returns (N, num_class) float32 logits.
    """
    N, L, C = x.shape
    num_class = w.shape[0]
    NCp = _round_up(num_class, 128)
    wm = jnp.transpose(w.reshape(num_class, C), (1, 0)).astype(jnp.bfloat16)   # (C, nc)
    wm = jnp.pad(wm, ((0, 0), (0, NCp - num_class)))
    bp = jnp.pad(b.astype(jnp.float32).reshape(1, num_class),
                 ((0, 0), (0, NCp - num_class)))
    out = pl.pallas_call(
        _pool_fc_kernel,
        out_shape=jax.ShapeDtypeStruct((N, 1, NCp), jnp.float32),
        grid=(N,),
        in_specs=[pl.BlockSpec((None, L, C), lambda n: (n, 0, 0)),
                  pl.BlockSpec((C, NCp), lambda n: (0, 0)),
                  pl.BlockSpec((1, NCp), lambda n: (0, 0))],
        out_specs=pl.BlockSpec((None, 1, NCp), lambda n: (n, 0, 0)),
        compiler_params=pltpu.CompilerParams(dimension_semantics=("parallel",)),
    )(x.astype(jnp.bfloat16), wm, bp)
    return out.reshape(N, NCp)[:, :num_class]


# ------------------------------------------------------------------
# Flash-style non-local (embedded Gaussian) attention
# ------------------------------------------------------------------
def _nl_attn_kernel(q_ref, k_ref, v_ref, o_ref, m_sc, l_sc, acc_sc, *, L, bkv):
    kv = pl.program_id(2)

    @pl.when(kv == 0)
    def _():
        m_sc[...] = jnp.full_like(m_sc, -1e30)
        l_sc[...] = jnp.zeros_like(l_sc)
        acc_sc[...] = jnp.zeros_like(acc_sc)

    s = lax.dot_general(q_ref[...], k_ref[...],
                        dimension_numbers=(((1,), (1,)), ((), ())),
                        preferred_element_type=jnp.float32)
    col = kv * bkv + lax.broadcasted_iota(jnp.int32, s.shape, 1)
    s = jnp.where(col < L, s, -1e30)
    m_new = jnp.maximum(m_sc[...], jnp.max(s, axis=-1, keepdims=True))
    alpha = jnp.exp(m_sc[...] - m_new)
    p = jnp.exp(s - m_new)
    l_sc[...] = alpha * l_sc[...] + jnp.sum(p, axis=-1, keepdims=True)
    acc_sc[...] = alpha * acc_sc[...] + jnp.dot(
        p.astype(v_ref.dtype), v_ref[...], preferred_element_type=jnp.float32)
    m_sc[...] = m_new

    @pl.when(kv == pl.num_programs(2) - 1)
    def _():
        o_ref[...] = (acc_sc[...] *
                      pl.reciprocal(l_sc[...], approx=True)).astype(o_ref.dtype)


@jax.jit
def nl_attention(theta, phi, g):
    """softmax(theta @ phi^T, -1) @ g per batch element.  theta/phi/g: (B, L, d)."""
    B, L, d = theta.shape
    bq = min(128, _round_up(L, 8))
    bkv = min(512, _round_up(L, 128))
    Lq = _round_up(L, bq)
    Lk = _round_up(L, bkv)

    def prep(a, Lp):
        a = a.astype(jnp.bfloat16)
        if Lp != L:
            a = jnp.pad(a, ((0, 0), (0, Lp - L), (0, 0)))
        return a

    q, k, v = prep(theta, Lq), prep(phi, Lk), prep(g, Lk)
    out = pl.pallas_call(
        functools.partial(_nl_attn_kernel, L=L, bkv=bkv),
        out_shape=jax.ShapeDtypeStruct((B, Lq, d), jnp.bfloat16),
        grid_spec=pltpu.PrefetchScalarGridSpec(
            num_scalar_prefetch=0,
            grid=(B, Lq // bq, Lk // bkv),
            in_specs=[
                pl.BlockSpec((None, bq, d), lambda b, i, j: (b, i, 0)),
                pl.BlockSpec((None, bkv, d), lambda b, i, j: (b, j, 0)),
                pl.BlockSpec((None, bkv, d), lambda b, i, j: (b, j, 0)),
            ],
            out_specs=pl.BlockSpec((None, bq, d), lambda b, i, j: (b, i, 0)),
            scratch_shapes=[pltpu.VMEM((bq, 1), jnp.float32),
                            pltpu.VMEM((bq, 1), jnp.float32),
                            pltpu.VMEM((bq, d), jnp.float32)],
        ),
        compiler_params=pltpu.CompilerParams(
            dimension_semantics=("parallel", "parallel", "arbitrary")),
    )(q, k, v)
    return out[:, :L, :]


# ------------------------------------------------------------------
# Deterministic synthetic parameters (no checkpoint loading)
# ------------------------------------------------------------------
class _Rng:
    def __init__(self, seed):
        self._key = jax.random.PRNGKey(seed)

    def next(self):
        self._key, sub = jax.random.split(self._key)
        return sub


def _conv_w(rng, cout, cin, kt, kh, kw, std=None):
    fan_in = cin * kt * kh * kw
    if std is None:
        std = (2.0 / fan_in) ** 0.5
    return std * jax.random.normal(rng.next(), (cout, cin, kt, kh, kw), jnp.float32)


def _bn_p(rng, c):
    gamma = 1.0 + 0.05 * jax.random.normal(rng.next(), (c,), jnp.float32)
    beta = 0.05 * jax.random.normal(rng.next(), (c,), jnp.float32)
    mean = 0.05 * jax.random.normal(rng.next(), (c,), jnp.float32)
    var = 1.0 + 0.1 * jax.random.uniform(rng.next(), (c,), jnp.float32)
    return gamma, beta, mean, var


def _fold_bn(bn, conv_bias=None, eps=1e-5):
    gamma, beta, mean, var = bn
    scale = gamma / jnp.sqrt(var + eps)
    bias = beta - mean * scale
    if conv_bias is not None:
        bias = bias + scale * conv_bias
    return scale, bias


# I3DR50 architecture constants (from the PyTorch source)
_LAYERS = (3, 4, 6, 3)
_PLANES = (64, 128, 256, 512)
_STRIDES = (1, 2, 2, 2)
_USE_TEMP = ((1, 1, 1), (1, 0, 1, 0), (1, 0, 1, 0, 1, 0), (0, 1, 0))
_NON_LOCAL = ((0, 0, 0), (0, 1, 0, 1), (0, 1, 0, 1, 0, 1), (0, 0, 0))
_EXPANSION = 4


def init_i3d_params(num_class, seed=0):
    # TODO(synk): i3dinit() loads a pretrained checkpoint; weights are synthesized
    # deterministically here instead.
    rng = _Rng(seed)
    params = {"conv1": _conv_w(rng, 64, 3, 5, 7, 7), "bn1": _bn_p(rng, 64)}
    inplanes = 64
    for li in range(4):
        planes = _PLANES[li]
        blocks = []
        for bi in range(_LAYERS[li]):
            stride = _STRIDES[li] if bi == 0 else 1
            use_temp = _USE_TEMP[li][bi]
            non_local = _NON_LOCAL[li][bi]
            p = {}
            if use_temp:
                p["conv1"] = _conv_w(rng, planes, inplanes, 3, 1, 1)
            else:
                p["conv1"] = _conv_w(rng, planes, inplanes, 1, 1, 1)
            p["bn1"] = _bn_p(rng, planes)
            p["conv2"] = _conv_w(rng, planes, planes, 1, 3, 3)
            p["bn2"] = _bn_p(rng, planes)
            p["conv3"] = _conv_w(rng, planes * _EXPANSION, planes, 1, 1, 1)
            p["bn3"] = _bn_p(rng, planes * _EXPANSION)
            if stride != 1 or inplanes != planes * _EXPANSION:
                p["down_conv"] = _conv_w(rng, planes * _EXPANSION, inplanes, 1, 1, 1)
                p["down_bn"] = _bn_p(rng, planes * _EXPANSION)
            if non_local:
                C = planes * _EXPANSION
                inter = C // 2
                p["nl"] = {
                    "theta_w": _conv_w(rng, inter, C, 1, 1, 1),
                    "theta_b": 0.01 * jax.random.normal(rng.next(), (inter,), jnp.float32),
                    "phi_w": _conv_w(rng, inter, C, 1, 1, 1),
                    "phi_b": 0.01 * jax.random.normal(rng.next(), (inter,), jnp.float32),
                    "g_w": _conv_w(rng, inter, C, 1, 1, 1),
                    "g_b": 0.01 * jax.random.normal(rng.next(), (inter,), jnp.float32),
                    "W_w": _conv_w(rng, C, inter, 1, 1, 1),
                    "W_b": 0.01 * jax.random.normal(rng.next(), (C,), jnp.float32),
                    "W_bn": _bn_p(rng, C),
                }
            blocks.append({"params": p, "stride": stride,
                           "use_temp": use_temp, "non_local": non_local})
            inplanes = planes * _EXPANSION
        params["layer%d" % (li + 1)] = blocks
    params["fullyconv_w"] = _conv_w(rng, num_class, 512 * _EXPANSION, 1, 1, 1, std=0.01)
    params["fullyconv_b"] = jnp.zeros((num_class,), jnp.float32)
    return params


# ------------------------------------------------------------------
# Forward pass
# ------------------------------------------------------------------
def _nonlocal_forward(x, p):
    # TODO(synk): NONLocalBlock3D source was not provided with the module; this is the
    # canonical embedded-Gaussian non-local block (sub_sample=False, bn_layer=True).
    N, T, H, W, C = x.shape
    inter = C // 2
    ones_i = jnp.ones((inter,), jnp.float32)
    s1, p0 = (1, 1, 1), (0, 0, 0)
    theta = conv3d_bn_act(x, p["theta_w"], ones_i, p["theta_b"], stride=s1, padding=p0, relu=False)
    phi = conv3d_bn_act(x, p["phi_w"], ones_i, p["phi_b"], stride=s1, padding=p0, relu=False)
    g = conv3d_bn_act(x, p["g_w"], ones_i, p["g_b"], stride=s1, padding=p0, relu=False)
    L = T * H * W
    y = nl_attention(theta.reshape(N, L, inter),
                     phi.reshape(N, L, inter),
                     g.reshape(N, L, inter)).reshape(N, T, H, W, inter)
    sW, bW = _fold_bn(p["W_bn"], conv_bias=p["W_b"])
    # W(y) + x fused into the matmul epilogue (residual add, no ReLU).
    z = conv3d_bn_act(y, p["W_w"], sW, bW, stride=s1, padding=p0, relu=False, residual=x)
    return z


def _bottleneck_forward(x, blk):
    p = blk["params"]
    stride = blk["stride"]
    s1, b1 = _fold_bn(p["bn1"])
    pad1 = (1, 0, 0) if blk["use_temp"] else (0, 0, 0)
    out = conv3d_bn_act(x, p["conv1"], s1, b1, stride=(1, 1, 1), padding=pad1, relu=True)
    s2, b2 = _fold_bn(p["bn2"])
    out = conv3d_bn_act(out, p["conv2"], s2, b2,
                        stride=(1, stride, stride), padding=(0, 1, 1), relu=True)
    if "down_conv" in p:
        sd, bd = _fold_bn(p["down_bn"])
        residual = conv3d_bn_act(x, p["down_conv"], sd, bd,
                                 stride=(1, stride, stride), padding=(0, 0, 0), relu=False)
    else:
        residual = x
    s3, b3 = _fold_bn(p["bn3"])
    # conv3 + BN3 + residual add + ReLU fused into a single kernel epilogue.
    out = conv3d_bn_act(out, p["conv3"], s3, b3, stride=(1, 1, 1), padding=(0, 0, 0),
                        relu=True, residual=residual)
    if blk["non_local"]:
        out = _nonlocal_forward(out, p["nl"])
    return out


def i3d_forward(params, x, num_segments):
    """x: (N, 3*num_segments, H, W) float32 (PyTorch stacked-frame convention)."""
    H, W = x.shape[-2], x.shape[-1]
    x = x.reshape((-1, 3, num_segments, H, W))      # N, C, T, H, W  (PyTorch NCDHW)
    x = jnp.transpose(x, (0, 2, 3, 4, 1))           # -> N, T, H, W, C (kernel layout)
    x = x.astype(jnp.bfloat16)
    s, b = _fold_bn(params["bn1"])
    x = conv3d_bn_act(x, params["conv1"], s, b, stride=(1, 2, 2), padding=(2, 3, 3), relu=True)
    x = maxpool3d(x, kernel=(1, 3, 3), stride=(1, 2, 2))
    for blk in params["layer1"]:
        x = _bottleneck_forward(x, blk)
    x = maxpool3d(x, kernel=(2, 1, 1), stride=(2, 1, 1))
    for name in ("layer2", "layer3", "layer4"):
        for blk in params[name]:
            x = _bottleneck_forward(x, blk)
    N, T, Hh, Ww, C = x.shape
    # TODO(synk): AvgPool3d(kernel=(4,7,7), stride=1) has exactly one window (== global
    # average) for the canonical 224x224 / 8-segment input; generalized here to a global
    # average over the actual final feature map so small test shapes run.
    # TODO(synk): nn.Dropout is identity under eval/inference semantics (not applied).
    logits = avgpool_fullyconv(x.reshape(N, T * Hh * Ww, C),
                               params["fullyconv_w"], params["fullyconv_b"])   # (N, nc) f32
    # Replicate the torch `.squeeze()` / batch==1 unsqueeze / `.squeeze(1)` chain.
    out = jnp.squeeze(logits)
    if out.ndim == 0:
        out = out.reshape(1)
    if out.ndim == 1:
        out = out[None, :]
    if out.shape[1] == 1:
        out = jnp.squeeze(out, axis=1)
    return out


if __name__ == "__main__":
    num_class = 16
    num_segments = 2      # small temporal extent: maxpool2 -> T=1
    spatial = 32          # small spatial extent: layer4 output is 1x1
    params = init_i3d_params(num_class, seed=0)
    key = jax.random.PRNGKey(0)
    x = jax.random.normal(key, (1, 3 * num_segments, spatial, spatial), jnp.float32)
    out = i3d_forward(params, x, num_segments)
    out = jax.block_until_ready(out)
    assert out.shape == (1, num_class), out.shape
    assert bool(jnp.all(jnp.isfinite(out)))
    print("KERNEL_OK")
</pallas_src>

<mosaic_0001>
module attributes {stable_mosaic.version = 11 : i64} {
  func.func @_mm_bias_act_kernel(%arg0: i32, %arg1: i32, %arg2: i32, %arg3: memref<512x512xbf16, #tpu.memory_space<vmem>>, %arg4: memref<512x128xbf16, #tpu.memory_space<vmem>>, %arg5: memref<1x128xf32, #tpu.memory_space<vmem>>, %arg6: memref<512x128xbf16, #tpu.memory_space<vmem>>, %arg7: memref<512x128xf32, #tpu.memory_space<vmem>>) attributes {dimension_semantics = [#tpu.dimension_semantics<parallel>, #tpu.dimension_semantics<parallel>, #tpu.dimension_semantics<arbitrary>], iteration_bounds = array<i64: 1, 1, 2>, scalar_prefetch = 0 : i64, scratch_operands = 1 : i64, tpu.core_type = #tpu.core_type<tc>, window_params = [{transform_indices = @transform_0, window_bounds = array<i64: 512, 512>}, {transform_indices = @transform_1, window_bounds = array<i64: 512, 128>}, {transform_indices = @transform_2, window_bounds = array<i64: 1, 128>}, {transform_indices = @transform_3, window_bounds = array<i64: 512, 128>}]} {
    %c0_i32 = arith.constant 0 : i32
    %0 = arith.cmpi eq, %arg2, %c0_i32 : i32
    %1 = arith.extui %0 : i1 to i32
    %c0_i32_0 = arith.constant 0 : i32
    %2 = arith.cmpi ne, %1, %c0_i32_0 : i32
    scf.if %2 {
      %cst_9 = arith.constant 0.000000e+00 : f32
      %12 = vector.broadcast %cst_9 : f32 to vector<512x128xf32>
      %c0_10 = arith.constant 0 : index
      %c0_11 = arith.constant 0 : index
      %13 = vector.load %arg7[%c0_10, %c0_11] : memref<512x128xf32, #tpu.memory_space<vmem>>, vector<512x128xf32>
      tpu.vector_store %arg7[%c0_10, %c0_11], %12 {strides = array<i32>} : memref<512x128xf32, #tpu.memory_space<vmem>>, vector<512x128xf32>,
    } else {
    }
    %c0 = arith.constant 0 : index
    %c0_1 = arith.constant 0 : index
    %3 = vector.load %arg7[%c0, %c0_1] : memref<512x128xf32, #tpu.memory_space<vmem>>, vector<512x128xf32>
    %c0_2 = arith.constant 0 : index
    %c0_3 = arith.constant 0 : index
    %4 = vector.load %arg3[%c0_2, %c0_3] : memref<512x512xbf16, #tpu.memory_space<vmem>>, vector<512x512xbf16>
    %c0_4 = arith.constant 0 : index
    %c0_5 = arith.constant 0 : index
    %5 = vector.load %arg4[%c0_4, %c0_5] : memref<512x128xbf16, #tpu.memory_space<vmem>>, vector<512x128xbf16>
    %cst = arith.constant dense<0.000000e+00> : vector<512x128xf32>
    %6 = tpu.matmul %4, %5, %cst {dimension_numbers = #tpu.dot_dimension_numbers<[1], [0], [0], [1], [0, 0, 1, 1], [], []>} : vector<512x512xbf16>, vector<512x128xbf16>, vector<512x128xf32> -> vector<512x128xf32>
    %7 = arith.addf %3, %6 : vector<512x128xf32>
    %c0_6 = arith.constant 0 : index
    %c0_7 = arith.constant 0 : index
    %8 = vector.load %arg7[%c0_6, %c0_7] : memref<512x128xf32, #tpu.memory_space<vmem>>, vector<512x128xf32>
    tpu.vector_store %arg7[%c0_6, %c0_7], %7 {strides = array<i32>} : memref<512x128xf32, #tpu.memory_space<vmem>>, vector<512x128xf32>,
    %c1_i32 = arith.constant 1 : i32
    %9 = arith.cmpi eq, %arg2, %c1_i32 : i32
    %10 = arith.extui %9 : i1 to i32
    %c0_i32_8 = arith.constant 0 : i32
    %11 = arith.cmpi ne, %10, %c0_i32_8 : i32
    scf.if %11 {
      %c0_9 = arith.constant 0 : index
      %c0_10 = arith.constant 0 : index
      %12 = vector.load %arg7[%c0_9, %c0_10] : memref<512x128xf32, #tpu.memory_space<vmem>>, vector<512x128xf32>
      %c0_11 = arith.constant 0 : index
      %c0_12 = arith.constant 0 : index
      %13 = vector.load %arg5[%c0_11, %c0_12] : memref<1x128xf32, #tpu.memory_space<vmem>>, vector<1x128xf32>
      %14 = vector.broadcast %13 : vector<1x128xf32> to vector<512x128xf32>
      %15 = arith.addf %12, %14 : vector<512x128xf32>
      %cst_13 = arith.constant 0.000000e+00 : f32
      %16 = vector.broadcast %cst_13 : f32 to vector<512x128xf32>
      %17 = arith.maximumf %15, %16 : vector<512x128xf32>
      %18 = arith.truncf %17 : vector<512x128xf32> to vector<512x128xbf16>
      %c0_14 = arith.constant 0 : index
      %c0_15 = arith.constant 0 : index
      %19 = vector.load %arg6[%c0_14, %c0_15] : memref<512x128xbf16, #tpu.memory_space<vmem>>, vector<512x128xbf16>
      tpu.vector_store %arg6[%c0_14, %c0_15], %18 {strides = array<i32>} : memref<512x128xbf16, #tpu.memory_space<vmem>>, vector<512x128xbf16>,
    } else {
    }
    return
  }
  func.func @transform_0(%arg0: i32, %arg1: i32, %arg2: i32) -> (i32, i32) {
    %c0_i32 = arith.constant 0 : i32
    return %arg0, %arg2 : i32, i32
  }
  func.func @transform_1(%arg0: i32, %arg1: i32, %arg2: i32) -> (i32, i32) {
    %c0_i32 = arith.constant 0 : i32
    return %arg2, %arg1 : i32, i32
  }
  func.func @transform_2(%arg0: i32, %arg1: i32, %arg2: i32) -> (i32, i32) {
    %c0_i32 = arith.constant 0 : i32
    %c0_i32_0 = arith.constant 0 : i32
    return %c0_i32, %arg1 : i32, i32
  }
  func.func @transform_3(%arg0: i32, %arg1: i32, %arg2: i32) -> (i32, i32) {
    %c0_i32 = arith.constant 0 : i32
    return %arg0, %arg1 : i32, i32
  }
}

</mosaic_0001>

<bundles_post_ra>
// kernel: conv3d_bn_act.1
= control target key start
LH: loop header
LB: loop body
LE: loop exit
PB: predicated region body
PF: predicated region fallthrough
CT: control target
= control target key end

     0   :  { %8 = vsyncpa [#allocation5], 0  ;;  %s3868_s12 = smov 0   ;;  %s3870_s13 = smov 0   ;;  %s4542_s0 = inlined_call_operand.vmem [shape: bf16[512,1024], index: 0, kind: input, shape index: {}]   ;;  %s4543_s1 = inlined_call_operand.vmem [shape: bf16[1024,128], index: 1, kind: input, shape index: {}]   ;;  %s4544_s2 = inlined_call_operand.vmem [shape: f32[1,128], index: 2, kind: input, shape index: {}]   ;;  %s4545_s3 = inlined_call_operand.hbm [shape: bf16[512,128], index: 3, kind: output, shape index: {}]  }
   0x1   :  { %s3872_s14 = smov 0   ;;  %s3874_s15 = smov 0  }
   0x2   :  { %s3876_s16 = smov 0  }
   0x3 LB: > { %s3002_s17 = sadd.s32 4294967295, %s3841_s16   ;;  %s26_s18 = sadd.s32 1, %s3837_s15  ;;  %s3841_s16 = sphi %s3876_s16, %s14_s16   ;;  %s3837_s15 = sphi %s3874_s15, %s4550_s15   ;;  %s3833_s14 = sphi %s3872_s14, %s4549_s14   ;;  %s3829_s13 = sphi %s3870_s13, %s4548_s13   ;;  %s3825_s12 = sphi %s3868_s12, %s4547_s12  }
   0x4   : > { %p27_p0 = scmp.ge.s32.totalorder %s26_s18, 2  ;;  %p49_p1 = scmp.ne.s32.totalorder %s3829_s13, %s3825_s12 }
   0x5   : > { %p50_p2 = scmp.eq.s32.totalorder %s3841_s16, 0  ;;  %s42_s20 = sadd.s32 1, %s3829_s13 }
   0x6   : > { %s4552_s18 = smov (%p27_p0, %s26_s18), 0  ;;  %p3005_p5 = scmp.ge.s32.totalorder %s3841_s16, 2 }
   0x7   : > { %p51_p3 = por %p50_p2, %p49_p1  ;;  %s38_s19 = ssub.s32 %s3837_s15, %s4552_s18 }
   0x8   : > { %p40_p4 = scmp.eq.s32.totalorder %s38_s19, 0  ;;  %163 = sbr.rel (%p3005_p5) target bundleno = 81 (0x51), region = 20 }
   0xa   : > { %s3904_s21 = scalar_select %p40_p4, %s3829_s13, %s42_s20  }
   0xd   : > { %166 = sbr.rel (!%p51_p3) target bundleno = 81 (0x51), region = 24  ;;  %s168_s22 = sand.u32 (%p51_p3), 1, %s3829_s13  }
   0xe   : > { %s3244_s23 = sshll.u32 (%p51_p3), %s3837_s15, 4  ;;  %s3006_s24 = sshll.u32 (%p51_p3), %s168_s22, 10 }
   0xf   : > { %s3912_s27 = scalar_lea.vmem (%p51_p3), %s4542_s0, %s3244_s23  ;;  %s3917_s28 = scalar_lea.vmem (%p51_p3), [#allocation3], %s3006_s24 }
  0x10   : > { %v189_v0 = vld [vmem:[%s3912_s27] sm:$0xff] (%p51_p3)  ;;  %v191_v1 = vld [vmem:[%s3912_s27 + $0x8] sm:$0xff] (%p51_p3) }
  0x11   : > { %v193_v2 = vld [vmem:[%s3912_s27 + $0x20] sm:$0xff] (%p51_p3)  ;;  %190 = vst [vmem:[%s3917_s28] sm:$0xff] (%p51_p3), %v189_v0  ;;  %192 = vst [vmem:[%s3917_s28 + $0x8] sm:$0xff] (%p51_p3), %v191_v1  ;;  %v195_v3 = vld [vmem:[%s3912_s27 + $0x28] sm:$0xff] (%p51_p3) }
  0x12   : > { %194 = vst [vmem:[%s3917_s28 + $0x10] sm:$0xff] %v193_v2  ;;  %v197_v4 = vld [vmem:[%s3912_s27 + $0x40] sm:$0xff]  ;;  %v199_v5 = vld [vmem:[%s3912_s27 + $0x48] sm:$0xff]  ;;  %196 = vst [vmem:[%s3917_s28 + $0x18] sm:$0xff] %v195_v3 }
  0x13   : > { %198 = vst [vmem:[%s3917_s28 + $0x20] sm:$0xff] %v197_v4  ;;  %200 = vst [vmem:[%s3917_s28 + $0x28] sm:$0xff] %v199_v5  ;;  %v201_v6 = vld [vmem:[%s3912_s27 + $0x60] sm:$0xff]  ;;  %v203_v7 = vld [vmem:[%s3912_s27 + $0x68] sm:$0xff] }
  0x14   : > { %v205_v8 = vld [vmem:[%s3912_s27 + $0x80] sm:$0xff]  ;;  %202 = vst [vmem:[%s3917_s28 + $0x30] sm:$0xff] %v201_v6  ;;  %204 = vst [vmem:[%s3917_s28 + $0x38] sm:$0xff] %v203_v7  ;;  %v207_v9 = vld [vmem:[%s3912_s27 + $0x88] sm:$0xff] }
  0x15   : > { %206 = vst [vmem:[%s3917_s28 + $0x40] sm:$0xff] %v205_v8  ;;  %v209_v10 = vld [vmem:[%s3912_s27 + $0xa0] sm:$0xff]  ;;  %v211_v11 = vld [vmem:[%s3912_s27 + $0xa8] sm:$0xff]  ;;  %208 = vst [vmem:[%s3917_s28 + $0x48] sm:$0xff] %v207_v9 }
  0x16   : > { %210 = vst [vmem:[%s3917_s28 + $0x50] sm:$0xff] %v209_v10  ;;  %212 = vst [vmem:[%s3917_s28 + $0x58] sm:$0xff] %v211_v11  ;;  %v213_v12 = vld [vmem:[%s3912_s27 + $0xc0] sm:$0xff]  ;;  %v215_v13 = vld [vmem:[%s3912_s27 + $0xc8] sm:$0xff] }
  0x17   : > { %v217_v14 = vld [vmem:[%s3912_s27 + $0xe0] sm:$0xff]  ;;  %214 = vst [vmem:[%s3917_s28 + $0x60] sm:$0xff] %v213_v12  ;;  %216 = vst [vmem:[%s3917_s28 + $0x68] sm:$0xff] %v215_v13  ;;  %v219_v15 = vld [vmem:[%s3912_s27 + $0xe8] sm:$0xff] }
  0x18   : > { %218 = vst [vmem:[%s3917_s28 + $0x70] sm:$0xff] %v217_v14  ;;  %v221_v16 = vld [vmem:[%s3912_s27 + $0x100] sm:$0xff]  ;;  %v223_v17 = vld [vmem:[%s3912_s27 + $0x108] sm:$0xff]  ;;  %220 = vst [vmem:[%s3917_s28 + $0x78] sm:$0xff] %v219_v15 }
  0x19   : > { %222 = vst [vmem:[%s3917_s28 + $0x80] sm:$0xff] %v221_v16  ;;  %224 = vst [vmem:[%s3917_s28 + $0x88] sm:$0xff] %v223_v17  ;;  %v225_v18 = vld [vmem:[%s3912_s27 + $0x120] sm:$0xff]  ;;  %v227_v19 = vld [vmem:[%s3912_s27 + $0x128] sm:$0xff] }
  0x1a   : > { %v229_v20 = vld [vmem:[%s3912_s27 + $0x140] sm:$0xff]  ;;  %226 = vst [vmem:[%s3917_s28 + $0x90] sm:$0xff] %v225_v18  ;;  %228 = vst [vmem:[%s3917_s28 + $0x98] sm:$0xff] %v227_v19  ;;  %v231_v21 = vld [vmem:[%s3912_s27 + $0x148] sm:$0xff] }
  0x1b   : > { %230 = vst [vmem:[%s3917_s28 + $0xa0] sm:$0xff] %v229_v20  ;;  %v233_v22 = vld [vmem:[%s3912_s27 + $0x160] sm:$0xff]  ;;  %v235_v23 = vld [vmem:[%s3912_s27 + $0x168] sm:$0xff]  ;;  %232 = vst [vmem:[%s3917_s28 + $0xa8] sm:$0xff] %v231_v21 }
  0x1c   : > { %234 = vst [vmem:[%s3917_s28 + $0xb0] sm:$0xff] %v233_v22  ;;  %236 = vst [vmem:[%s3917_s28 + $0xb8] sm:$0xff] %v235_v23  ;;  %v237_v24 = vld [vmem:[%s3912_s27 + $0x180] sm:$0xff]  ;;  %v239_v25 = vld [vmem:[%s3912_s27 + $0x188] sm:$0xff] }
  0x1d   : > { %v241_v26 = vld [vmem:[%s3912_s27 + $0x1a0] sm:$0xff]  ;;  %238 = vst [vmem:[%s3917_s28 + $0xc0] sm:$0xff] %v237_v24  ;;  %240 = vst [vmem:[%s3917_s28 + $0xc8] sm:$0xff] %v239_v25  ;;  %v243_v27 = vld [vmem:[%s3912_s27 + $0x1a8] sm:$0xff] }
  0x1e   : > { %242 = vst [vmem:[%s3917_s28 + $0xd0] sm:$0xff] %v241_v26  ;;  %v245_v28 = vld [vmem:[%s3912_s27 + $0x1c0] sm:$0xff]  ;;  %v247_v29 = vld [vmem:[%s3912_s27 + $0x1c8] sm:$0xff]  ;;  %244 = vst [vmem:[%s3917_s28 + $0xd8] sm:$0xff] %v243_v27 }
  0x1f   : > { %246 = vst [vmem:[%s3917_s28 + $0xe0] sm:$0xff] %v245_v28  ;;  %248 = vst [vmem:[%s3917_s28 + $0xe8] sm:$0xff] %v247_v29  ;;  %v249_v30 = vld [vmem:[%s3912_s27 + $0x1e0] sm:$0xff]  ;;  %v251_v31 = vld [vmem:[%s3912_s27 + $0x1e8] sm:$0xff] }
  0x20   : > { %v253_v32 = vld [vmem:[%s3912_s27 + $0x200] sm:$0xff]  ;;  %250 = vst [vmem:[%s3917_s28 + $0xf0] sm:$0xff] %v249_v30  ;;  %252 = vst [vmem:[%s3917_s28 + $0xf8] sm:$0xff] %v251_v31  ;;  %v255_v33 = vld [vmem:[%s3912_s27 + $0x208] sm:$0xff] }
  0x21   : > { %254 = vst [vmem:[%s3917_s28 + $0x100] sm:$0xff] %v253_v32  ;;  %v257_v34 = vld [vmem:[%s3912_s27 + $0x220] sm:$0xff]  ;;  %v259_v35 = vld [vmem:[%s3912_s27 + $0x228] sm:$0xff]  ;;  %256 = vst [vmem:[%s3917_s28 + $0x108] sm:$0xff] %v255_v33 }
  0x22   : > { %258 = vst [vmem:[%s3917_s28 + $0x110] sm:$0xff] %v257_v34  ;;  %260 = vst [vmem:[%s3917_s28 + $0x118] sm:$0xff] %v259_v35  ;;  %v261_v36 = vld [vmem:[%s3912_s27 + $0x240] sm:$0xff]  ;;  %v263_v37 = vld [vmem:[%s3912_s27 + $0x248] sm:$0xff] }
  0x23   : > { %v265_v38 = vld [vmem:[%s3912_s27 + $0x260] sm:$0xff]  ;;  %262 = vst [vmem:[%s3917_s28 + $0x120] sm:$0xff] %v261_v36  ;;  %264 = vst [vmem:[%s3917_s28 + $0x128] sm:$0xff] %v263_v37  ;;  %v267_v39 = vld [vmem:[%s3912_s27 + $0x268] sm:$0xff] }
  0x24   : > { %266 = vst [vmem:[%s3917_s28 + $0x130] sm:$0xff] %v265_v38  ;;  %v269_v40 = vld [vmem:[%s3912_s27 + $0x280] sm:$0xff]  ;;  %v271_v41 = vld [vmem:[%s3912_s27 + $0x288] sm:$0xff]  ;;  %268 = vst [vmem:[%s3917_s28 + $0x138] sm:$0xff] %v267_v39 }
  0x25   : > { %270 = vst [vmem:[%s3917_s28 + $0x140] sm:$0xff] %v269_v40  ;;  %272 = vst [vmem:[%s3917_s28 + $0x148] sm:$0xff] %v271_v41  ;;  %v273_v42 = vld [vmem:[%s3912_s27 + $0x2a0] sm:$0xff]  ;;  %v275_v43 = vld [vmem:[%s3912_s27 + $0x2a8] sm:$0xff] }
  0x26   : > { %v277_v44 = vld [vmem:[%s3912_s27 + $0x2c0] sm:$0xff]  ;;  %274 = vst [vmem:[%s3917_s28 + $0x150] sm:$0xff] %v273_v42  ;;  %276 = vst [vmem:[%s3917_s28 + $0x158] sm:$0xff] %v275_v43  ;;  %v279_v45 = vld [vmem:[%s3912_s27 + $0x2c8] sm:$0xff] }
  0x27   : > { %278 = vst [vmem:[%s3917_s28 + $0x160] sm:$0xff] %v277_v44  ;;  %v281_v46 = vld [vmem:[%s3912_s27 + $0x2e0] sm:$0xff]  ;;  %v283_v47 = vld [vmem:[%s3912_s27 + $0x2e8] sm:$0xff]  ;;  %280 = vst [vmem:[%s3917_s28 + $0x168] sm:$0xff] %v279_v45 }
  0x28   : > { %282 = vst [vmem:[%s3917_s28 + $0x170] sm:$0xff] %v281_v46  ;;  %284 = vst [vmem:[%s3917_s28 + $0x178] sm:$0xff] %v283_v47  ;;  %v285_v48 = vld [vmem:[%s3912_s27 + $0x300] sm:$0xff]  ;;  %v287_v49 = vld [vmem:[%s3912_s27 + $0x308] sm:$0xff] }
  0x29   : > { %v289_v50 = vld [vmem:[%s3912_s27 + $0x320] sm:$0xff]  ;;  %286 = vst [vmem:[%s3917_s28 + $0x180] sm:$0xff] %v285_v48  ;;  %288 = vst [vmem:[%s3917_s28 + $0x188] sm:$0xff] %v287_v49  ;;  %v291_v51 = vld [vmem:[%s3912_s27 + $0x328] sm:$0xff] }
  0x2a   : > { %290 = vst [vmem:[%s3917_s28 + $0x190] sm:$0xff] %v289_v50  ;;  %v293_v52 = vld [vmem:[%s3912_s27 + $0x340] sm:$0xff]  ;;  %v295_v53 = vld [vmem:[%s3912_s27 + $0x348] sm:$0xff]  ;;  %292 = vst [vmem:[%s3917_s28 + $0x198] sm:$0xff] %v291_v51 }
  0x2b   : > { %294 = vst [vmem:[%s3917_s28 + $0x1a0] sm:$0xff] %v293_v52  ;;  %296 = vst [vmem:[%s3917_s28 + $0x1a8] sm:$0xff] %v295_v53  ;;  %v297_v54 = vld [vmem:[%s3912_s27 + $0x360] sm:$0xff]  ;;  %v299_v55 = vld [vmem:[%s3912_s27 + $0x368] sm:$0xff] }
  0x2c   : > { %v301_v56 = vld [vmem:[%s3912_s27 + $0x380] sm:$0xff]  ;;  %298 = vst [vmem:[%s3917_s28 + $0x1b0] sm:$0xff] %v297_v54  ;;  %300 = vst [vmem:[%s3917_s28 + $0x1b8] sm:$0xff] %v299_v55  ;;  %v303_v57 = vld [vmem:[%s3912_s27 + $0x388] sm:$0xff] }
  0x2d   : > { %302 = vst [vmem:[%s3917_s28 + $0x1c0] sm:$0xff] %v301_v56  ;;  %v305_v58 = vld [vmem:[%s3912_s27 + $0x3a0] sm:$0xff]  ;;  %v307_v59 = vld [vmem:[%s3912_s27 + $0x3a8] sm:$0xff]  ;;  %304 = vst [vmem:[%s3917_s28 + $0x1c8] sm:$0xff] %v303_v57 }
  0x2e   : > { %306 = vst [vmem:[%s3917_s28 + $0x1d0] sm:$0xff] %v305_v58  ;;  %308 = vst [vmem:[%s3917_s28 + $0x1d8] sm:$0xff] %v307_v59  ;;  %v309_v60 = vld [vmem:[%s3912_s27 + $0x3c0] sm:$0xff]  ;;  %v311_v61 = vld [vmem:[%s3912_s27 + $0x3c8] sm:$0xff] }
  0x2f   : > { %v313_v62 = vld [vmem:[%s3912_s27 + $0x3e0] sm:$0xff]  ;;  %310 = vst [vmem:[%s3917_s28 + $0x1e0] sm:$0xff] %v309_v60  ;;  %312 = vst [vmem:[%s3917_s28 + $0x1e8] sm:$0xff] %v311_v61  ;;  %v315_v63 = vld [vmem:[%s3912_s27 + $0x3e8] sm:$0xff] }
  0x30   : > { %314 = vst [vmem:[%s3917_s28 + $0x1f0] sm:$0xff] %v313_v62  ;;  %v317_v0 = vld [vmem:[%s3912_s27 + $0x400] sm:$0xff]  ;;  %v319_v1 = vld [vmem:[%s3912_s27 + $0x408] sm:$0xff]  ;;  %316 = vst [vmem:[%s3917_s28 + $0x1f8] sm:$0xff] %v315_v63 }
  0x31   : > { %318 = vst [vmem:[%s3917_s28 + $0x200] sm:$0xff] %v317_v0  ;;  %320 = vst [vmem:[%s3917_s28 + $0x208] sm:$0xff] %v319_v1  ;;  %v321_v2 = vld [vmem:[%s3912_s27 + $0x420] sm:$0xff]  ;;  %v323_v3 = vld [vmem:[%s3912_s27 + $0x428] sm:$0xff] }
  0x32   : > { %v325_v4 = vld [vmem:[%s3912_s27 + $0x440] sm:$0xff]  ;;  %322 = vst [vmem:[%s3917_s28 + $0x210] sm:$0xff] %v321_v2  ;;  %324 = vst [vmem:[%s3917_s28 + $0x218] sm:$0xff] %v323_v3  ;;  %v327_v5 = vld [vmem:[%s3912_s27 + $0x448] sm:$0xff] }
  0x33   : > { %326 = vst [vmem:[%s3917_s28 + $0x220] sm:$0xff] %v325_v4  ;;  %v329_v6 = vld [vmem:[%s3912_s27 + $0x460] sm:$0xff]  ;;  %v331_v7 = vld [vmem:[%s3912_s27 + $0x468] sm:$0xff]  ;;  %328 = vst [vmem:[%s3917_s28 + $0x228] sm:$0xff] %v327_v5 }
  0x34   : > { %330 = vst [vmem:[%s3917_s28 + $0x230] sm:$0xff] %v329_v6  ;;  %332 = vst [vmem:[%s3917_s28 + $0x238] sm:$0xff] %v331_v7  ;;  %v333_v8 = vld [vmem:[%s3912_s27 + $0x480] sm:$0xff]  ;;  %v335_v9 = vld [vmem:[%s3912_s27 + $0x488] sm:$0xff] }
  0x35   : > { %v337_v10 = vld [vmem:[%s3912_s27 + $0x4a0] sm:$0xff]  ;;  %334 = vst [vmem:[%s3917_s28 + $0x240] sm:$0xff] %v333_v8  ;;  %336 = vst [vmem:[%s3917_s28 + $0x248] sm:$0xff] %v335_v9  ;;  %v339_v11 = vld [vmem:[%s3912_s27 + $0x4a8] sm:$0xff] }
  0x36   : > { %338 = vst [vmem:[%s3917_s28 + $0x250] sm:$0xff] %v337_v10  ;;  %v341_v12 = vld [vmem:[%s3912_s27 + $0x4c0] sm:$0xff]  ;;  %v343_v13 = vld [vmem:[%s3912_s27 + $0x4c8] sm:$0xff]  ;;  %340 = vst [vmem:[%s3917_s28 + $0x258] sm:$0xff] %v339_v11 }
  0x37   : > { %342 = vst [vmem:[%s3917_s28 + $0x260] sm:$0xff] %v341_v12  ;;  %344 = vst [vmem:[%s3917_s28 + $0x268] sm:$0xff] %v343_v13  ;;  %v345_v14 = vld [vmem:[%s3912_s27 + $0x4e0] sm:$0xff]  ;;  %v347_v15 = vld [vmem:[%s3912_s27 + $0x4e8] sm:$0xff] }
  0x38   : > { %v349_v16 = vld [vmem:[%s3912_s27 + $0x500] sm:$0xff]  ;;  %346 = vst [vmem:[%s3917_s28 + $0x270] sm:$0xff] %v345_v14  ;;  %348 = vst [vmem:[%s3917_s28 + $0x278] sm:$0xff] %v347_v15  ;;  %v351_v17 = vld [vmem:[%s3912_s27 + $0x508] sm:$0xff] }
  0x39   : > { %350 = vst [vmem:[%s3917_s28 + $0x280] sm:$0xff] %v349_v16  ;;  %v353_v18 = vld [vmem:[%s3912_s27 + $0x520] sm:$0xff]  ;;  %v355_v19 = vld [vmem:[%s3912_s27 + $0x528] sm:$0xff]  ;;  %352 = vst [vmem:[%s3917_s28 + $0x288] sm:$0xff] %v351_v17 }
  0x3a   : > { %354 = vst [vmem:[%s3917_s28 + $0x290] sm:$0xff] %v353_v18  ;;  %356 = vst [vmem:[%s3917_s28 + $0x298] sm:$0xff] %v355_v19  ;;  %v357_v20 = vld [vmem:[%s3912_s27 + $0x540] sm:$0xff]  ;;  %v359_v21 = vld [vmem:[%s3912_s27 + $0x548] sm:$0xff] }
  0x3b   : > { %v361_v22 = vld [vmem:[%s3912_s27 + $0x560] sm:$0xff]  ;;  %358 = vst [vmem:[%s3917_s28 + $0x2a0] sm:$0xff] %v357_v20  ;;  %360 = vst [vmem:[%s3917_s28 + $0x2a8] sm:$0xff] %v359_v21  ;;  %v363_v23 = vld [vmem:[%s3912_s27 + $0x568] sm:$0xff] }
  0x3c   : > { %362 = vst [vmem:[%s3917_s28 + $0x2b0] sm:$0xff] %v361_v22  ;;  %v365_v24 = vld [vmem:[%s3912_s27 + $0x580] sm:$0xff]  ;;  %v367_v25 = vld [vmem:[%s3912_s27 + $0x588] sm:$0xff]  ;;  %364 = vst [vmem:[%s3917_s28 + $0x2b8] sm:$0xff] %v363_v23 }
  0x3d   : > { %366 = vst [vmem:[%s3917_s28 + $0x2c0] sm:$0xff] %v365_v24  ;;  %368 = vst [vmem:[%s3917_s28 + $0x2c8] sm:$0xff] %v367_v25  ;;  %v369_v26 = vld [vmem:[%s3912_s27 + $0x5a0] sm:$0xff]  ;;  %v371_v27 = vld [vmem:[%s3912_s27 + $0x5a8] sm:$0xff] }
  0x3e   : > { %v373_v28 = vld [vmem:[%s3912_s27 + $0x5c0] sm:$0xff]  ;;  %370 = vst [vmem:[%s3917_s28 + $0x2d0] sm:$0xff] %v369_v26  ;;  %372 = vst [vmem:[%s3917_s28 + $0x2d8] sm:$0xff] %v371_v27  ;;  %v375_v29 = vld [vmem:[%s3912_s27 + $0x5c8] sm:$0xff] }
  0x3f   : > { %374 = vst [vmem:[%s3917_s28 + $0x2e0] sm:$0xff] %v373_v28  ;;  %v377_v30 = vld [vmem:[%s3912_s27 + $0x5e0] sm:$0xff]  ;;  %v379_v31 = vld [vmem:[%s3912_s27 + $0x5e8] sm:$0xff]  ;;  %376 = vst [vmem:[%s3917_s28 + $0x2e8] sm:$0xff] %v375_v29 }
  0x40   : > { %378 = vst [vmem:[%s3917_s28 + $0x2f0] sm:$0xff] %v377_v30  ;;  %380 = vst [vmem:[%s3917_s28 + $0x2f8] sm:$0xff] %v379_v31  ;;  %v381_v32 = vld [vmem:[%s3912_s27 + $0x600] sm:$0xff]  ;;  %v383_v33 = vld [vmem:[%s3912_s27 + $0x608] sm:$0xff] }
  0x41   : > { %v385_v34 = vld [vmem:[%s3912_s27 + $0x620] sm:$0xff]  ;;  %382 = vst [vmem:[%s3917_s28 + $0x300] sm:$0xff] %v381_v32  ;;  %384 = vst [vmem:[%s3917_s28 + $0x308] sm:$0xff] %v383_v33  ;;  %v387_v35 = vld [vmem:[%s3912_s27 + $0x628] sm:$0xff] }
  0x42   : > { %386 = vst [vmem:[%s3917_s28 + $0x310] sm:$0xff] %v385_v34  ;;  %v389_v36 = vld [vmem:[%s3912_s27 + $0x640] sm:$0xff]  ;;  %v391_v37 = vld [vmem:[%s3912_s27 + $0x648] sm:$0xff]  ;;  %388 = vst [vmem:[%s3917_s28 + $0x318] sm:$0xff] %v387_v35 }
  0x43   : > { %390 = vst [vmem:[%s3917_s28 + $0x320] sm:$0xff] %v389_v36  ;;  %392 = vst [vmem:[%s3917_s28 + $0x328] sm:$0xff] %v391_v37  ;;  %v393_v38 = vld [vmem:[%s3912_s27 + $0x660] sm:$0xff]  ;;  %v395_v39 = vld [vmem:[%s3912_s27 + $0x668] sm:$0xff] }
  0x44   : > { %v397_v40 = vld [vmem:[%s3912_s27 + $0x680] sm:$0xff]  ;;  %394 = vst [vmem:[%s3917_s28 + $0x330] sm:$0xff] %v393_v38  ;;  %396 = vst [vmem:[%s3917_s28 + $0x338] sm:$0xff] %v395_v39  ;;  %v399_v41 = vld [vmem:[%s3912_s27 + $0x688] sm:$0xff] }
  0x45   : > { %398 = vst [vmem:[%s3917_s28 + $0x340] sm:$0xff] %v397_v40  ;;  %v401_v42 = vld [vmem:[%s3912_s27 + $0x6a0] sm:$0xff]  ;;  %v403_v43 = vld [vmem:[%s3912_s27 + $0x6a8] sm:$0xff]  ;;  %400 = vst [vmem:[%s3917_s28 + $0x348] sm:$0xff] %v399_v41 }
  0x46   : > { %402 = vst [vmem:[%s3917_s28 + $0x350] sm:$0xff] %v401_v42  ;;  %404 = vst [vmem:[%s3917_s28 + $0x358] sm:$0xff] %v403_v43  ;;  %v405_v44 = vld [vmem:[%s3912_s27 + $0x6c0] sm:$0xff]  ;;  %v407_v45 = vld [vmem:[%s3912_s27 + $0x6c8] sm:$0xff] }
  0x47   : > { %v409_v46 = vld [vmem:[%s3912_s27 + $0x6e0] sm:$0xff]  ;;  %406 = vst [vmem:[%s3917_s28 + $0x360] sm:$0xff] %v405_v44  ;;  %408 = vst [vmem:[%s3917_s28 + $0x368] sm:$0xff] %v407_v45  ;;  %v411_v47 = vld [vmem:[%s3912_s27 + $0x6e8] sm:$0xff] }
  0x48   : > { %410 = vst [vmem:[%s3917_s28 + $0x370] sm:$0xff] %v409_v46  ;;  %v413_v48 = vld [vmem:[%s3912_s27 + $0x700] sm:$0xff]  ;;  %v415_v49 = vld [vmem:[%s3912_s27 + $0x708] sm:$0xff]  ;;  %412 = vst [vmem:[%s3917_s28 + $0x378] sm:$0xff] %v411_v47 }
  0x49   : > { %414 = vst [vmem:[%s3917_s28 + $0x380] sm:$0xff] %v413_v48  ;;  %416 = vst [vmem:[%s3917_s28 + $0x388] sm:$0xff] %v415_v49  ;;  %v417_v50 = vld [vmem:[%s3912_s27 + $0x720] sm:$0xff]  ;;  %v419_v51 = vld [vmem:[%s3912_s27 + $0x728] sm:$0xff] }
  0x4a   : > { %v421_v52 = vld [vmem:[%s3912_s27 + $0x740] sm:$0xff]  ;;  %418 = vst [vmem:[%s3917_s28 + $0x390] sm:$0xff] %v417_v50  ;;  %420 = vst [vmem:[%s3917_s28 + $0x398] sm:$0xff] %v419_v51  ;;  %v423_v53 = vld [vmem:[%s3912_s27 + $0x748] sm:$0xff] }
  0x4b   : > { %422 = vst [vmem:[%s3917_s28 + $0x3a0] sm:$0xff] %v421_v52  ;;  %v425_v54 = vld [vmem:[%s3912_s27 + $0x760] sm:$0xff]  ;;  %v427_v55 = vld [vmem:[%s3912_s27 + $0x768] sm:$0xff]  ;;  %424 = vst [vmem:[%s3917_s28 + $0x3a8] sm:$0xff] %v423_v53 }
  0x4c   : > { %426 = vst [vmem:[%s3917_s28 + $0x3b0] sm:$0xff] %v425_v54  ;;  %428 = vst [vmem:[%s3917_s28 + $0x3b8] sm:$0xff] %v427_v55  ;;  %v429_v56 = vld [vmem:[%s3912_s27 + $0x780] sm:$0xff]  ;;  %v431_v57 = vld [vmem:[%s3912_s27 + $0x788] sm:$0xff] }
  0x4d   : > { %v433_v58 = vld [vmem:[%s3912_s27 + $0x7a0] sm:$0xff]  ;;  %430 = vst [vmem:[%s3917_s28 + $0x3c0] sm:$0xff] %v429_v56  ;;  %432 = vst [vmem:[%s3917_s28 + $0x3c8] sm:$0xff] %v431_v57  ;;  %v435_v59 = vld [vmem:[%s3912_s27 + $0x7a8] sm:$0xff] }
  0x4e   : > { %434 = vst [vmem:[%s3917_s28 + $0x3d0] sm:$0xff] %v433_v58  ;;  %v437_v60 = vld [vmem:[%s3912_s27 + $0x7c0] sm:$0xff]  ;;  %v439_v61 = vld [vmem:[%s3912_s27 + $0x7c8] sm:$0xff]  ;;  %436 = vst [vmem:[%s3917_s28 + $0x3d8] sm:$0xff] %v435_v59 }
  0x4f   : > { %438 = vst [vmem:[%s3917_s28 + $0x3e0] sm:$0xff] %v437_v60  ;;  %440 = vst [vmem:[%s3917_s28 + $0x3e8] sm:$0xff] %v439_v61  ;;  %v441_v62 = vld [vmem:[%s3912_s27 + $0x7e0] sm:$0xff]  ;;  %v443_v63 = vld [vmem:[%s3912_s27 + $0x7e8] sm:$0xff] }
  0x50   : > { %442 = vst [vmem:[%s3917_s28 + $0x3f0] sm:$0xff] %v441_v62  ;;  %444 = vst [vmem:[%s3917_s28 + $0x3f8] sm:$0xff] %v443_v63 }
  0x51 PF: > { %p3009_p6 = scmp.ge.s32.totalorder %s3841_s16, 1  ;;  %p461_p7 = scmp.lt.s32.totalorder %s3841_s16, 3 }
  0x53   : > { %p462_p8 = pnand %p3009_p6, %p461_p7 }
  0x54   : > { %s468_s29 = sand.u32 (!%p462_p8), 1, %s3825_s12   ;;  %s3011_s30 = sshll.u32 (!%p462_p8), %s3833_s14, 6 }
  0x55   : > { %465 = sbr.rel (%p462_p8) target bundleno = 705 (0x2c1), region = 51  ;;  %s3010_s4 = sshll.u32 (!%p462_p8), %s468_s29, 10 }
  0x56   : > { %p500_p9 = scmp.lt.s32.totalorder (!%p462_p8), %s3011_s30, 127  ;;  %s4181_s9 = scalar_lea.vmem (!%p462_p8), [#allocation3], %s3010_s4 }
  0x57   : > { %p3013_p10 = scmp.ne.s32.totalorder (!%p462_p8), %s3833_s14, 0 }
  0x5a   : > { %s4554_s30 = smov (!%p500_p9, %s3011_s30), 127  ;;  %516 = sbr.rel (%p3013_p10) target bundleno = 128 (0x80), region = 59 }
  0x5b   : > { %s3012_s5 = sshll.u32 %s4554_s30, 2 }
  0x5c   : > { %s4179_s8 = scalar_lea.vmem %s4543_s1, %s3012_s5 }
  0x5f   : > { %v3843_v0 = vmov 0.0  }
  0x60   : > { %517 = vst [vmem:[#allocation2 + $0xb0] sm:$0xff] %v3843_v0  ;;  %518 = vst [vmem:[#allocation2 + $0x1b0] sm:$0xff] %v3843_v0 }
  0x61   : > { %519 = vst [vmem:[#allocation2 + $0xd8] sm:$0xff] %v3843_v0  ;;  %520 = vst [vmem:[#allocation2 + $0x18] sm:$0xff] %v3843_v0 }
  0x62   : > { %521 = vst [vmem:[#allocation2 + $0x50] sm:$0xff] %v3843_v0  ;;  %522 = vst [vmem:[#allocation2 + $0x168] sm:$0xff] %v3843_v0 }
  0x63   : > { %523 = vst [vmem:[#allocation2 + $0x130] sm:$0xff] %v3843_v0  ;;  %524 = vst [vmem:[#allocation2 + $0x48] sm:$0xff] %v3843_v0 }
  0x64   : > { %525 = vst [vmem:[#allocation2 + $0x180] sm:$0xff] %v3843_v0  ;;  %526 = vst [vmem:[#allocation2 + $0x110] sm:$0xff] %v3843_v0 }
  0x65   : > { %527 = vst [vmem:[#allocation2 + $0x118] sm:$0xff] %v3843_v0  ;;  %528 = vst [vmem:[#allocation2 + $0x98] sm:$0xff] %v3843_v0 }
  0x66   : > { %529 = vst [vmem:[#allocation2 + $0x120] sm:$0xff] %v3843_v0  ;;  %530 = vst [vmem:[#allocation2 + $0x150] sm:$0xff] %v3843_v0 }
  0x67   : > { %531 = vst [vmem:[#allocation2 + $0x108] sm:$0xff] %v3843_v0  ;;  %532 = vst [vmem:[#allocation2 + $0x60] sm:$0xff] %v3843_v0 }
  0x68   : > { %533 = vst [vmem:[#allocation2 + $0xe0] sm:$0xff] %v3843_v0  ;;  %534 = vst [vmem:[#allocation2 + $0x188] sm:$0xff] %v3843_v0 }
  0x69   : > { %535 = vst [vmem:[#allocation2 + $0x138] sm:$0xff] %v3843_v0  ;;  %536 = vst [vmem:[#allocation2 + $0x140] sm:$0xff] %v3843_v0 }
  0x6a   : > { %537 = vst [vmem:[#allocation2 + $0x80] sm:$0xff] %v3843_v0  ;;  %538 = vst [vmem:[#allocation2 + $0x1a8] sm:$0xff] %v3843_v0 }
  0x6b   : > { %539 = vst [vmem:[#allocation2 + $0x1b8] sm:$0xff] %v3843_v0  ;;  %540 = vst [vmem:[#allocation2 + $0x28] sm:$0xff] %v3843_v0 }
  0x6c   : > { %541 = vst [vmem:[#allocation2 + $0x1e8] sm:$0xff] %v3843_v0  ;;  %542 = vst [vmem:[#allocation2 + $0xf8] sm:$0xff] %v3843_v0 }
  0x6d   : > { %543 = vst [vmem:[#allocation2 + $0x160] sm:$0xff] %v3843_v0  ;;  %544 = vst [vmem:[#allocation2 + $0x30] sm:$0xff] %v3843_v0 }
  0x6e   : > { %545 = vst [vmem:[#allocation2 + $0x1e0] sm:$0xff] %v3843_v0  ;;  %546 = vst [vmem:[#allocation2] sm:$0xff] %v3843_v0 }
  0x6f   : > { %547 = vst [vmem:[#allocation2 + $0xf0] sm:$0xff] %v3843_v0  ;;  %548 = vst [vmem:[#allocation2 + $0x8] sm:$0xff] %v3843_v0 }
  0x70   : > { %549 = vst [vmem:[#allocation2 + $0x148] sm:$0xff] %v3843_v0  ;;  %550 = vst [vmem:[#allocation2 + $0x1d0] sm:$0xff] %v3843_v0 }
  0x71   : > { %551 = vst [vmem:[#allocation2 + $0x100] sm:$0xff] %v3843_v0  ;;  %552 = vst [vmem:[#allocation2 + $0xc8] sm:$0xff] %v3843_v0 }
  0x72   : > { %553 = vst [vmem:[#allocation2 + $0x40] sm:$0xff] %v3843_v0  ;;  %554 = vst [vmem:[#allocation2 + $0x1f8] sm:$0xff] %v3843_v0 }
  0x73   : > { %555 = vst [vmem:[#allocation2 + $0x20] sm:$0xff] %v3843_v0  ;;  %556 = vst [vmem:[#allocation2 + $0x128] sm:$0xff] %v3843_v0 }
  0x74   : > { %557 = vst [vmem:[#allocation2 + $0x1a0] sm:$0xff] %v3843_v0  ;;  %558 = vst [vmem:[#allocation2 + $0x1f0] sm:$0xff] %v3843_v0 }
  0x75   : > { %559 = vst [vmem:[#allocation2 + $0xe8] sm:$0xff] %v3843_v0  ;;  %560 = vst [vmem:[#allocation2 + $0x78] sm:$0xff] %v3843_v0 }
  0x76   : > { %561 = vst [vmem:[#allocation2 + $0x70] sm:$0xff] %v3843_v0  ;;  %562 = vst [vmem:[#allocation2 + $0x90] sm:$0xff] %v3843_v0 }
  0x77   : > { %563 = vst [vmem:[#allocation2 + $0x1d8] sm:$0xff] %v3843_v0  ;;  %564 = vst [vmem:[#allocation2 + $0xd0] sm:$0xff] %v3843_v0 }
  0x78   : > { %565 = vst [vmem:[#allocation2 + $0xb8] sm:$0xff] %v3843_v0  ;;  %566 = vst [vmem:[#allocation2 + $0x88] sm:$0xff] %v3843_v0 }
  0x79   : > { %567 = vst [vmem:[#allocation2 + $0xa8] sm:$0xff] %v3843_v0  ;;  %568 = vst [vmem:[#allocation2 + $0x1c8] sm:$0xff] %v3843_v0 }
  0x7a   : > { %569 = vst [vmem:[#allocation2 + $0x170] sm:$0xff] %v3843_v0  ;;  %570 = vst [vmem:[#allocation2 + $0x178] sm:$0xff] %v3843_v0 }
  0x7b   : > { %571 = vst [vmem:[#allocation2 + $0x68] sm:$0xff] %v3843_v0  ;;  %572 = vst [vmem:[#allocation2 + $0x190] sm:$0xff] %v3843_v0 }
  0x7c   : > { %573 = vst [vmem:[#allocation2 + $0x198] sm:$0xff] %v3843_v0  ;;  %574 = vst [vmem:[#allocation2 + $0x38] sm:$0xff] %v3843_v0 }
  0x7d   : > { %575 = vst [vmem:[#allocation2 + $0xc0] sm:$0xff] %v3843_v0  ;;  %576 = vst [vmem:[#allocation2 + $0x1c0] sm:$0xff] %v3843_v0 }
  0x7e   : > { %577 = vst [vmem:[#allocation2 + $0x158] sm:$0xff] %v3843_v0  ;;  %578 = vst [vmem:[#allocation2 + $0x10] sm:$0xff] %v3843_v0 }
  0x7f   : > { %579 = vst [vmem:[#allocation2 + $0x58] sm:$0xff] %v3843_v0  ;;  %580 = vst [vmem:[#allocation2 + $0xa0] sm:$0xff] %v3843_v0 }
  0x80 PF: > { %v3551_v1 = vld [vmem:[%s4179_s8 + $0x38] sm:$0xff]   ;;  %v3844_v2 = vmov 0   ;;  %v3553_v4 = vld [vmem:[%s4179_s8 + $0x30] sm:$0xff]   ;;  %v3555_v6 = vld [vmem:[%s4179_s8 + $0x28] sm:$0xff]   ;;  %p3174_p11 = scmp.ne.s32.totalorder %s3833_s14, 1 }
  0x81   : > { %1669 = vmatprep.subr.bf16.mxu0 %v3844_v2  ;;  %1958 = vmatprep.subr.bf16.mxu1 %v3844_v2  ;;  %v3552_v3 = vld [vmem:[%s4179_s8 + $0xb8] sm:$0xff]   ;;  %v3554_v5 = vld [vmem:[%s4179_s8 + $0xb0] sm:$0xff]   ;;  %v3556_v7 = vld [vmem:[%s4179_s8 + $0xa8] sm:$0xff]  }
  0x82   : > { %1670 = vmatpush1.bf16.msra.mxu0 %v3551_v1  ;;  %1959 = vmatpush1.bf16.msra.mxu1 %v3552_v3  ;;  %v3557_v8 = vld [vmem:[%s4179_s8 + $0x20] sm:$0xff]   ;;  %v3559_v10 = vld [vmem:[%s4179_s8 + $0x18] sm:$0xff]   ;;  %v3561_v12 = vld [vmem:[%s4179_s8 + $0x10] sm:$0xff]  }
  0x83   : > { %1671 = vmatprep.subr.bf16.mxu0 %v3844_v2  ;;  %1960 = vmatprep.subr.bf16.mxu1 %v3844_v2  ;;  %v3558_v9 = vld [vmem:[%s4179_s8 + $0xa0] sm:$0xff]   ;;  %v3560_v11 = vld [vmem:[%s4179_s8 + $0x98] sm:$0xff]   ;;  %v3562_v13 = vld [vmem:[%s4179_s8 + $0x90] sm:$0xff]  }
  0x84   : > { %v3563_v14 = vld [vmem:[%s4179_s8 + $0x8] sm:$0xff]   ;;  %v3565_v16 = vld [vmem:[%s4179_s8] sm:$0xff]   ;;  %v3567_v18 = vld [vmem:[%s4179_s8 + $0x78] sm:$0xff]  }
  0x85   : > { %v3564_v15 = vld [vmem:[%s4179_s8 + $0x88] sm:$0xff]   ;;  %v3566_v17 = vld [vmem:[%s4179_s8 + $0x80] sm:$0xff]   ;;  %v3568_v19 = vld [vmem:[%s4179_s8 + $0xf8] sm:$0xff]  }
  0x86   : > { %1672 = vmatpush1.bf16.msra.mxu0 %v3553_v4  ;;  %1961 = vmatpush1.bf16.msra.mxu1 %v3554_v5  ;;  %v3585_v20 = vld [vmem:[%s4181_s9 + $0x4] ss:$16 sps:$4 sm:$0xff]   ;;  %v3588_v22 = vld [vmem:[%s4181_s9 + $0xc] ss:$16 sps:$4 sm:$0xff]   ;;  %v3583_v36 = vld [vmem:[%s4181_s9] ss:$16 sps:$4 sm:$0xff]  }
  0x87   : > { %1673 = vmatprep.subr.bf16.mxu0 %v3844_v2  ;;  %1962 = vmatprep.subr.bf16.mxu1 %v3844_v2  ;;  %v3569_v21 = vld [vmem:[%s4179_s8 + $0x70] sm:$0xff]   ;;  %v3571_v24 = vld [vmem:[%s4179_s8 + $0x68] sm:$0xff]   ;;  %v3573_v26 = vld [vmem:[%s4179_s8 + $0x60] sm:$0xff]  }
  0x88   : > { %v3570_v23 = vld [vmem:[%s4179_s8 + $0xf0] sm:$0xff]   ;;  %1701 = vmatprep.mubr.bf16.mxu0 %v3585_v20  ;;  %1990 = vmatprep.mubr.bf16.mxu1 %v3588_v22  ;;  %v3572_v25 = vld [vmem:[%s4179_s8 + $0xe8] sm:$0xff]   ;;  %v3574_v27 = vld [vmem:[%s4179_s8 + $0xe0] sm:$0xff]  }
  0x89   : > { %v3575_v28 = vld [vmem:[%s4179_s8 + $0x58] sm:$0xff]   ;;  %v3577_v30 = vld [vmem:[%s4179_s8 + $0x50] sm:$0xff]   ;;  %v3579_v32 = vld [vmem:[%s4179_s8 + $0x48] sm:$0xff]  }
  0x8a   : > { %1674 = vmatpush1.bf16.msra.mxu0 %v3555_v6  ;;  %1963 = vmatpush1.bf16.msra.mxu1 %v3556_v7  ;;  %v3576_v29 = vld [vmem:[%s4179_s8 + $0xd8] sm:$0xff]   ;;  %v3578_v31 = vld [vmem:[%s4179_s8 + $0xd0] sm:$0xff]   ;;  %v3580_v33 = vld [vmem:[%s4179_s8 + $0xc8] sm:$0xff]  }
  0x8b   : > { %1675 = vmatprep.subr.bf16.mxu0 %v3844_v2  ;;  %1964 = vmatprep.subr.bf16.mxu1 %v3844_v2  ;;  %v3581_v34 = vld [vmem:[%s4179_s8 + $0x40] sm:$0xff]   ;;  %v3586_v37 = vld [vmem:[%s4181_s9 + $0x8] ss:$16 sps:$4 sm:$0xff]   ;;  %v3591_v39 = vld [vmem:[%s4181_s9 + $0x2c] ss:$16 sps:$4 sm:$0xff]  }
  0x8c   : > { %v3582_v35 = vld [vmem:[%s4179_s8 + $0xc0] sm:$0xff]   ;;  %v3594_v41 = vld [vmem:[%s4181_s9 + $0x28] ss:$16 sps:$4 sm:$0xff]   ;;  %v3597_v43 = vld [vmem:[%s4181_s9 + $0x4c] ss:$16 sps:$4 sm:$0xff]  }
  0x8d   : > { %v3589_v38 = vld [vmem:[%s4181_s9 + $0x24] ss:$16 sps:$4 sm:$0xff]   ;;  %v3593_v40 = vld [vmem:[%s4181_s9 + $0x20] ss:$16 sps:$4 sm:$0xff]   ;;  %v3600_v45 = vld [vmem:[%s4181_s9 + $0x48] ss:$16 sps:$4 sm:$0xff]  }
  0x8e   : > { %1676 = vmatpush1.bf16.msra.mxu0 %v3557_v8  ;;  %1965 = vmatpush1.bf16.msra.mxu1 %v3558_v9  ;;  %v3595_v42 = vld [vmem:[%s4181_s9 + $0x44] ss:$16 sps:$4 sm:$0xff]   ;;  %v3599_v44 = vld [vmem:[%s4181_s9 + $0x40] ss:$16 sps:$4 sm:$0xff]   ;;  %v3603_v47 = vld [vmem:[%s4181_s9 + $0x6c] ss:$16 sps:$4 sm:$0xff]  }
  0x8f   : > { %1677 = vmatprep.subr.bf16.mxu0 %v3844_v2  ;;  %1966 = vmatprep.subr.bf16.mxu1 %v3844_v2  ;;  %v3601_v46 = vld [vmem:[%s4181_s9 + $0x64] ss:$16 sps:$4 sm:$0xff]   ;;  %v3605_v48 = vld [vmem:[%s4181_s9 + $0x60] ss:$16 sps:$4 sm:$0xff]   ;;  %v3606_v49 = vld [vmem:[%s4181_s9 + $0x68] ss:$16 sps:$4 sm:$0xff]  }
  0x90   : > { %v3607_v50 = vld [vmem:[%s4181_s9 + $0x84] ss:$16 sps:$4 sm:$0xff]   ;;  %v3609_v51 = vld [vmem:[%s4181_s9 + $0x8c] ss:$16 sps:$4 sm:$0xff]   ;;  %v3611_v52 = vld [vmem:[%s4181_s9 + $0x80] ss:$16 sps:$4 sm:$0xff]  }
  0x91   : > { %v3612_v53 = vld [vmem:[%s4181_s9 + $0x88] ss:$16 sps:$4 sm:$0xff]   ;;  %v3613_v54 = vld [vmem:[%s4181_s9 + $0xa4] ss:$16 sps:$4 sm:$0xff]   ;;  %v3615_v55 = vld [vmem:[%s4181_s9 + $0xac] ss:$16 sps:$4 sm:$0xff]  }
  0x92   : > { %1678 = vmatpush1.bf16.msra.mxu0 %v3559_v10  ;;  %1967 = vmatpush1.bf16.msra.mxu1 %v3560_v11  ;;  %v3617_v56 = vld [vmem:[%s4181_s9 + $0xa0] ss:$16 sps:$4 sm:$0xff]   ;;  %v3618_v57 = vld [vmem:[%s4181_s9 + $0xa8] ss:$16 sps:$4 sm:$0xff]   ;;  %v3619_v58 = vld [vmem:[%s4181_s9 + $0xc4] ss:$16 sps:$4 sm:$0xff]  }
  0x93   : > { %1679 = vmatprep.subr.bf16.mxu0 %v3844_v2  ;;  %1968 = vmatprep.subr.bf16.mxu1 %v3844_v2  ;;  %v3621_v59 = vld [vmem:[%s4181_s9 + $0xcc] ss:$16 sps:$4 sm:$0xff]   ;;  %v3623_v60 = vld [vmem:[%s4181_s9 + $0xc0] ss:$16 sps:$4 sm:$0xff]   ;;  %v3624_v61 = vld [vmem:[%s4181_s9 + $0xc8] ss:$16 sps:$4 sm:$0xff]  }
  0x94   : > { %v3625_v62 = vld [vmem:[%s4181_s9 + $0xe4] ss:$16 sps:$4 sm:$0xff]   ;;  %v3627_v63 = vld [vmem:[%s4181_s9 + $0xec] ss:$16 sps:$4 sm:$0xff]   ;;  %v3629_v0 = vld [vmem:[%s4181_s9 + $0xe0] ss:$16 sps:$4 sm:$0xff]  }
  0x95   : > { %v3630_v1 = vld [vmem:[%s4181_s9 + $0xe8] ss:$16 sps:$4 sm:$0xff]   ;;  %v3633_v3 = vld [vmem:[%s4181_s9 + $0x10c] ss:$16 sps:$4 sm:$0xff]   ;;  %v3635_v4 = vld [vmem:[%s4181_s9 + $0x100] ss:$16 sps:$4 sm:$0xff]  }
  0x96   : > { %1680 = vmatpush1.bf16.msra.mxu0 %v3561_v12  ;;  %1969 = vmatpush1.bf16.msra.mxu1 %v3562_v13  ;;  %v3636_v5 = vld [vmem:[%s4181_s9 + $0x108] ss:$16 sps:$4 sm:$0xff]   ;;  %v3637_v6 = vld [vmem:[%s4181_s9 + $0x124] ss:$16 sps:$4 sm:$0xff]   ;;  %v3639_v7 = vld [vmem:[%s4181_s9 + $0x12c] ss:$16 sps:$4 sm:$0xff]  }
  0x97   : > { %1681 = vmatprep.subr.bf16.mxu0 %v3844_v2  ;;  %1970 = vmatprep.subr.bf16.mxu1 %v3844_v2  ;;  %v3641_v8 = vld [vmem:[%s4181_s9 + $0x120] ss:$16 sps:$4 sm:$0xff]   ;;  %v3642_v9 = vld [vmem:[%s4181_s9 + $0x128] ss:$16 sps:$4 sm:$0xff]   ;;  %v3643_v10 = vld [vmem:[%s4181_s9 + $0x144] ss:$16 sps:$4 sm:$0xff]  }
  0x98   : > { %v3645_v11 = vld [vmem:[%s4181_s9 + $0x14c] ss:$16 sps:$4 sm:$0xff]   ;;  %v3647_v12 = vld [vmem:[%s4181_s9 + $0x140] ss:$16 sps:$4 sm:$0xff]   ;;  %v3648_v13 = vld [vmem:[%s4181_s9 + $0x148] ss:$16 sps:$4 sm:$0xff]  }
  0x99   : > { %v3659_v20 = vld [vmem:[%s4181_s9 + $0x180] ss:$16 sps:$4 sm:$0xff]   ;;  %v3661_v22 = vld [vmem:[%s4181_s9 + $0x1a4] ss:$16 sps:$4 sm:$0xff]  }
  0x9a   : > { %1682 = vmatpush1.bf16.msra.mxu0 %v3563_v14  ;;  %1971 = vmatpush1.bf16.msra.mxu1 %v3564_v15  ;;  %v3649_v14 = vld [vmem:[%s4181_s9 + $0x164] ss:$16 sps:$4 sm:$0xff]   ;;  %v3651_v15 = vld [vmem:[%s4181_s9 + $0x16c] ss:$16 sps:$4 sm:$0xff]  }
  0x9b   : > { %1683 = vmatprep.subr.bf16.mxu0 %v3844_v2  ;;  %1972 = vmatprep.subr.bf16.mxu1 %v3844_v2 }
  0x9e   : > { %1684 = vmatpush1.bf16.msra.mxu0 %v3565_v16  ;;  %1973 = vmatpush1.bf16.msra.mxu1 %v3566_v17  ;;  %v3653_v16 = vld [vmem:[%s4181_s9 + $0x160] ss:$16 sps:$4 sm:$0xff]   ;;  %v3654_v17 = vld [vmem:[%s4181_s9 + $0x168] ss:$16 sps:$4 sm:$0xff]  }
  0x9f   : > { %1685 = vmatprep.subr.bf16.mxu0 %v3844_v2  ;;  %1974 = vmatprep.subr.bf16.mxu1 %v3844_v2 }
  0xa2   : > { %1686 = vmatpush2.bf16.msra.mxu0 %v3567_v18  ;;  %1975 = vmatpush2.bf16.msra.mxu1 %v3568_v19  ;;  %v3655_v18 = vld [vmem:[%s4181_s9 + $0x184] ss:$16 sps:$4 sm:$0xff]   ;;  %v3657_v19 = vld [vmem:[%s4181_s9 + $0x18c] ss:$16 sps:$4 sm:$0xff]  }
  0xa3   : > { %1687 = vmatprep.subr.bf16.mxu0 %v3844_v2  ;;  %1976 = vmatprep.subr.bf16.mxu1 %v3844_v2 }
  0xa6   : > { %1688 = vmatpush2.bf16.msra.mxu0 %v3569_v21  ;;  %1977 = vmatpush2.bf16.msra.mxu1 %v3570_v23  ;;  %v3660_v21 = vld [vmem:[%s4181_s9 + $0x188] ss:$16 sps:$4 sm:$0xff]   ;;  %v3663_v23 = vld [vmem:[%s4181_s9 + $0x1ac] ss:$16 sps:$4 sm:$0xff]  }
  0xa7   : > { %1689 = vmatprep.subr.bf16.mxu0 %v3844_v2  ;;  %1978 = vmatprep.subr.bf16.mxu1 %v3844_v2 }
  0xaa   : > { %1690 = vmatpush2.bf16.msra.mxu0 %v3571_v24  ;;  %1979 = vmatpush2.bf16.msra.mxu1 %v3572_v25  ;;  %v3665_v24 = vld [vmem:[%s4181_s9 + $0x1a0] ss:$16 sps:$4 sm:$0xff]   ;;  %v3666_v25 = vld [vmem:[%s4181_s9 + $0x1a8] ss:$16 sps:$4 sm:$0xff]  }
  0xab   : > { %1691 = vmatprep.subr.bf16.mxu0 %v3844_v2  ;;  %1980 = vmatprep.subr.bf16.mxu1 %v3844_v2 }
  0xae   : > { %1692 = vmatpush2.bf16.msra.mxu0 %v3573_v26  ;;  %1981 = vmatpush2.bf16.msra.mxu1 %v3574_v27  ;;  %v3667_v26 = vld [vmem:[%s4181_s9 + $0x1c4] ss:$16 sps:$4 sm:$0xff]   ;;  %v3669_v27 = vld [vmem:[%s4181_s9 + $0x1cc] ss:$16 sps:$4 sm:$0xff]  }
  0xaf   : > { %1693 = vmatprep.subr.bf16.mxu0 %v3844_v2  ;;  %1982 = vmatprep.subr.bf16.mxu1 %v3844_v2 }
  0xb2   : > { %1694 = vmatpush2.bf16.msra.mxu0 %v3575_v28  ;;  %1983 = vmatpush2.bf16.msra.mxu1 %v3576_v29  ;;  %v3671_v28 = vld [vmem:[%s4181_s9 + $0x1c0] ss:$16 sps:$4 sm:$0xff]   ;;  %v3672_v29 = vld [vmem:[%s4181_s9 + $0x1c8] ss:$16 sps:$4 sm:$0xff]  }
  0xb3   : > { %1695 = vmatprep.subr.bf16.mxu0 %v3844_v2  ;;  %1984 = vmatprep.subr.bf16.mxu1 %v3844_v2 }
  0xb6   : > { %1696 = vmatpush2.bf16.msra.mxu0 %v3577_v30  ;;  %1985 = vmatpush2.bf16.msra.mxu1 %v3578_v31  ;;  %v3673_v30 = vld [vmem:[%s4181_s9 + $0x1e4] ss:$16 sps:$4 sm:$0xff]   ;;  %v3675_v31 = vld [vmem:[%s4181_s9 + $0x1ec] ss:$16 sps:$4 sm:$0xff]  }
  0xb7   : > { %1697 = vmatprep.subr.bf16.mxu0 %v3844_v2  ;;  %1986 = vmatprep.subr.bf16.mxu1 %v3844_v2 }
  0xba   : > { %1698 = vmatpush2.bf16.msra.mxu0 %v3579_v32  ;;  %1987 = vmatpush2.bf16.msra.mxu1 %v3580_v33  ;;  %v3677_v32 = vld [vmem:[%s4181_s9 + $0x1e0] ss:$16 sps:$4 sm:$0xff]   ;;  %v3678_v33 = vld [vmem:[%s4181_s9 + $0x1e8] ss:$16 sps:$4 sm:$0xff]  }
  0xbb   : > { %1699 = vmatprep.subr.bf16.mxu0 %v3844_v2  ;;  %1988 = vmatprep.subr.bf16.mxu1 %v3844_v2  ;;  %v3631_v2 = vld [vmem:[%s4181_s9 + $0x104] ss:$16 sps:$4 sm:$0xff]  }
  0xbe   : > { %1700 = vmatpush2.bf16.msra.mxu0 %v3581_v34  ;;  %1989 = vmatpush2.bf16.msra.mxu1 %v3582_v35  ;;  %v3679_v34 = vld [vmem:[%s4181_s9 + $0x204] ss:$16 sps:$4 sm:$0xff]   ;;  %v3681_v35 = vld [vmem:[%s4181_s9 + $0x20c] ss:$16 sps:$4 sm:$0xff]  }
  0xc1   : > { %1702 = vmatmul.mubr.bf16.vlgmr.msra.gmra.mxu0 %v3583_v36  ;;  %1991 = vmatmul.mubr.bf16.vlgmr.msra.gmra.mxu1 %v3586_v37  ;;  %v3683_v36 = vld [vmem:[%s4181_s9 + $0x200] ss:$16 sps:$4 sm:$0xff]   ;;  %v3684_v37 = vld [vmem:[%s4181_s9 + $0x208] ss:$16 sps:$4 sm:$0xff]  }
  0xc2   : > { %1709 = vmatprep.mubr.bf16.mxu0 %v3589_v38  ;;  %1998 = vmatprep.mubr.bf16.mxu1 %v3591_v39  ;;  %v3685_v38 = vld [vmem:[%s4181_s9 + $0x224] ss:$16 sps:$4 sm:$0xff]   ;;  %v3687_v39 = vld [vmem:[%s4181_s9 + $0x22c] ss:$16 sps:$4 sm:$0xff]  }
  0xc9   : > { %1710 = vmatmul.mubr.bf16.gmra.mxu0 %v3593_v40  ;;  %1999 = vmatmul.mubr.bf16.gmra.mxu1 %v3594_v41  ;;  %v3689_v40 = vld [vmem:[%s4181_s9 + $0x220] ss:$16 sps:$4 sm:$0xff]   ;;  %v3690_v41 = vld [vmem:[%s4181_s9 + $0x228] ss:$16 sps:$4 sm:$0xff]  }
  0xca   : > { %1717 = vmatprep.mubr.bf16.mxu0 %v3595_v42  ;;  %2006 = vmatprep.mubr.bf16.mxu1 %v3597_v43  ;;  %v3691_v42 = vld [vmem:[%s4181_s9 + $0x244] ss:$16 sps:$4 sm:$0xff]   ;;  %v3693_v43 = vld [vmem:[%s4181_s9 + $0x24c] ss:$16 sps:$4 sm:$0xff]  }
  0xd1   : > { %1718 = vmatmul.mubr.bf16.gmra.mxu0 %v3599_v44  ;;  %2007 = vmatmul.mubr.bf16.gmra.mxu1 %v3600_v45  ;;  %v3695_v44 = vld [vmem:[%s4181_s9 + $0x240] ss:$16 sps:$4 sm:$0xff]   ;;  %v3696_v45 = vld [vmem:[%s4181_s9 + $0x248] ss:$16 sps:$4 sm:$0xff]  }
  0xd2   : > { %1725 = vmatprep.mubr.bf16.mxu0 %v3601_v46  ;;  %2014 = vmatprep.mubr.bf16.mxu1 %v3603_v47  ;;  %v3697_v46 = vld [vmem:[%s4181_s9 + $0x264] ss:$16 sps:$4 sm:$0xff]   ;;  %v3699_v47 = vld [vmem:[%s4181_s9 + $0x26c] ss:$16 sps:$4 sm:$0xff]  }
  0xd9   : > { %1726 = vmatmul.mubr.bf16.gmra.mxu0 %v3605_v48  ;;  %2015 = vmatmul.mubr.bf16.gmra.mxu1 %v3606_v49  ;;  %v3701_v48 = vld [vmem:[%s4181_s9 + $0x260] ss:$16 sps:$4 sm:$0xff]   ;;  %v3702_v49 = vld [vmem:[%s4181_s9 + $0x268] ss:$16 sps:$4 sm:$0xff]  }
  0xda   : > { %1733 = vmatprep.mubr.bf16.mxu0 %v3607_v50  ;;  %2022 = vmatprep.mubr.bf16.mxu1 %v3609_v51  ;;  %v3703_v50 = vld [vmem:[%s4181_s9 + $0x284] ss:$16 sps:$4 sm:$0xff]   ;;  %v3705_v51 = vld [vmem:[%s4181_s9 + $0x28c] ss:$16 sps:$4 sm:$0xff]  }
  0xe1   : > { %1734 = vmatmul.mubr.bf16.gmra.mxu0 %v3611_v52  ;;  %2023 = vmatmul.mubr.bf16.gmra.mxu1 %v3612_v53  ;;  %v3707_v52 = vld [vmem:[%s4181_s9 + $0x280] ss:$16 sps:$4 sm:$0xff]   ;;  %v3708_v53 = vld [vmem:[%s4181_s9 + $0x288] ss:$16 sps:$4 sm:$0xff]  }
  0xe2   : > { %1741 = vmatprep.mubr.bf16.mxu0 %v3613_v54  ;;  %2030 = vmatprep.mubr.bf16.mxu1 %v3615_v55  ;;  %v3709_v54 = vld [vmem:[%s4181_s9 + $0x2a4] ss:$16 sps:$4 sm:$0xff]   ;;  %v3711_v55 = vld [vmem:[%s4181_s9 + $0x2ac] ss:$16 sps:$4 sm:$0xff]  }
  0xe9   : > { %1742 = vmatmul.mubr.bf16.gmra.mxu0 %v3617_v56  ;;  %2031 = vmatmul.mubr.bf16.gmra.mxu1 %v3618_v57  ;;  %v3713_v56 = vld [vmem:[%s4181_s9 + $0x2a0] ss:$16 sps:$4 sm:$0xff]   ;;  %v3714_v57 = vld [vmem:[%s4181_s9 + $0x2a8] ss:$16 sps:$4 sm:$0xff]  }
  0xea   : > { %1749 = vmatprep.mubr.bf16.mxu0 %v3619_v58  ;;  %2038 = vmatprep.mubr.bf16.mxu1 %v3621_v59  ;;  %v3715_v58 = vld [vmem:[%s4181_s9 + $0x2c4] ss:$16 sps:$4 sm:$0xff]   ;;  %v3717_v59 = vld [vmem:[%s4181_s9 + $0x2cc] ss:$16 sps:$4 sm:$0xff]  }
  0xf1   : > { %1750 = vmatmul.mubr.bf16.gmra.mxu0 %v3623_v60  ;;  %2039 = vmatmul.mubr.bf16.gmra.mxu1 %v3624_v61  ;;  %v3719_v60 = vld [vmem:[%s4181_s9 + $0x2c0] ss:$16 sps:$4 sm:$0xff]   ;;  %v3720_v61 = vld [vmem:[%s4181_s9 + $0x2c8] ss:$16 sps:$4 sm:$0xff]  }
  0xf2   : > { %1757 = vmatprep.mubr.bf16.mxu0 %v3625_v62  ;;  %2046 = vmatprep.mubr.bf16.mxu1 %v3627_v63  ;;  %v3721_v62 = vld [vmem:[%s4181_s9 + $0x2e4] ss:$16 sps:$4 sm:$0xff]   ;;  %v3723_v63 = vld [vmem:[%s4181_s9 + $0x2ec] ss:$16 sps:$4 sm:$0xff]  }
  0xf9   : > { %1758 = vmatmul.mubr.bf16.gmra.mxu0 %v3629_v0  ;;  %2047 = vmatmul.mubr.bf16.gmra.mxu1 %v3630_v1  ;;  %v3725_v0 = vld [vmem:[%s4181_s9 + $0x2e0] ss:$16 sps:$4 sm:$0xff]   ;;  %v3726_v1 = vld [vmem:[%s4181_s9 + $0x2e8] ss:$16 sps:$4 sm:$0xff]  }
  0xfa   : > { %1765 = vmatprep.mubr.bf16.mxu0 %v3631_v2  ;;  %2054 = vmatprep.mubr.bf16.mxu1 %v3633_v3  ;;  %v3727_v2 = vld [vmem:[%s4181_s9 + $0x304] ss:$16 sps:$4 sm:$0xff]   ;;  %v3729_v3 = vld [vmem:[%s4181_s9 + $0x30c] ss:$16 sps:$4 sm:$0xff]  }
 0x101   : > { %1766 = vmatmul.mubr.bf16.gmra.mxu0 %v3635_v4  ;;  %2055 = vmatmul.mubr.bf16.gmra.mxu1 %v3636_v5  ;;  %v3731_v4 = vld [vmem:[%s4181_s9 + $0x300] ss:$16 sps:$4 sm:$0xff]   ;;  %v3732_v5 = vld [vmem:[%s4181_s9 + $0x308] ss:$16 sps:$4 sm:$0xff]  }
 0x102   : > { %1773 = vmatprep.mubr.bf16.mxu0 %v3637_v6  ;;  %2062 = vmatprep.mubr.bf16.mxu1 %v3639_v7  ;;  %v3733_v6 = vld [vmem:[%s4181_s9 + $0x324] ss:$16 sps:$4 sm:$0xff]   ;;  %v3735_v7 = vld [vmem:[%s4181_s9 + $0x32c] ss:$16 sps:$4 sm:$0xff]  }
 0x109   : > { %1774 = vmatmul.mubr.bf16.gmra.mxu0 %v3641_v8  ;;  %2063 = vmatmul.mubr.bf16.gmra.mxu1 %v3642_v9  ;;  %v581_v9 = vld [vmem:[#allocation2 + $0xb0] sm:$0xff] }
 0x10a   : > { %1781 = vmatprep.mubr.bf16.mxu0 %v3643_v10  ;;  %2070 = vmatprep.mubr.bf16.mxu1 %v3645_v11 }
 0x111   : > { %1782 = vmatmul.mubr.bf16.gmra.mxu0 %v3647_v12  ;;  %2071 = vmatmul.mubr.bf16.gmra.mxu1 %v3648_v13 }
 0x112   : > { %1789 = vmatprep.mubr.bf16.mxu0 %v3649_v14  ;;  %2078 = vmatprep.mubr.bf16.mxu1 %v3651_v15 }
 0x119   : > { %1790 = vmatmul.mubr.bf16.gmra.mxu0 %v3653_v16  ;;  %2079 = vmatmul.mubr.bf16.gmra.mxu1 %v3654_v17  ;;  %v3737_v16 = vld [vmem:[%s4181_s9 + $0x320] ss:$16 sps:$4 sm:$0xff]  }
 0x11a   : > { %1797 = vmatprep.mubr.bf16.mxu0 %v3655_v18  ;;  %2086 = vmatprep.mubr.bf16.mxu1 %v3657_v19  ;;  %v582_v17 = vld [vmem:[#allocation2 + $0x1b0] sm:$0xff]  ;;  %v3738_v19 = vld [vmem:[%s4181_s9 + $0x328] ss:$16 sps:$4 sm:$0xff]  }
 0x121   : > { %1798 = vmatmul.mubr.bf16.gmra.mxu0 %v3659_v20  ;;  %2087 = vmatmul.mubr.bf16.gmra.mxu1 %v3660_v21  ;;  %v3739_v20 = vld [vmem:[%s4181_s9 + $0x344] ss:$16 sps:$4 sm:$0xff]  }
 0x122   : > { %1805 = vmatprep.mubr.bf16.mxu0 %v3661_v22  ;;  %2094 = vmatprep.mubr.bf16.mxu1 %v3663_v23  ;;  %v3741_v23 = vld [vmem:[%s4181_s9 + $0x34c] ss:$16 sps:$4 sm:$0xff]  }
 0x129   : > { %1806 = vmatmul.mubr.bf16.gmra.mxu0 %v3665_v24  ;;  %2095 = vmatmul.mubr.bf16.gmra.mxu1 %v3666_v25 }
 0x12a   : > { %1813 = vmatprep.mubr.bf16.mxu0 %v3667_v26  ;;  %2102 = vmatprep.mubr.bf16.mxu1 %v3669_v27  ;;  %v583_v27 = vld [vmem:[#allocation2 + $0xd8] sm:$0xff] }
 0x131   : > { %1814 = vmatmul.mubr.bf16.gmra.mxu0 %v3671_v28  ;;  %2103 = vmatmul.mubr.bf16.gmra.mxu1 %v3672_v29 }
 0x132   : > { %1821 = vmatprep.mubr.bf16.mxu0 %v3673_v30  ;;  %2110 = vmatprep.mubr.bf16.mxu1 %v3675_v31 }
 0x139   : > { %1822 = vmatmul.mubr.bf16.gmra.mxu0 %v3677_v32  ;;  %2111 = vmatmul.mubr.bf16.gmra.mxu1 %v3678_v33 }
 0x13a   : > { %1829 = vmatprep.mubr.bf16.mxu0 %v3679_v34  ;;  %2118 = vmatprep.mubr.bf16.mxu1 %v3681_v35  ;;  %v3743_v34 = vld [vmem:[%s4181_s9 + $0x340] ss:$16 sps:$4 sm:$0xff]   ;;  %v584_v35 = vld [vmem:[#allocation2 + $0x18] sm:$0xff] }
 0x141   : > { %1830 = vmatmul.mubr.bf16.gmra.mxu0 %v3683_v36  ;;  %2119 = vmatmul.mubr.bf16.gmra.mxu1 %v3684_v37  ;;  %v3744_v37 = vld [vmem:[%s4181_s9 + $0x348] ss:$16 sps:$4 sm:$0xff]  }
 0x142   : > { %1837 = vmatprep.mubr.bf16.mxu0 %v3685_v38  ;;  %2126 = vmatprep.mubr.bf16.mxu1 %v3687_v39  ;;  %v3745_v38 = vld [vmem:[%s4181_s9 + $0x364] ss:$16 sps:$4 sm:$0xff]  }
 0x149   : > { %1838 = vmatmul.mubr.bf16.gmra.mxu0 %v3689_v40  ;;  %2127 = vmatmul.mubr.bf16.gmra.mxu1 %v3690_v41  ;;  %v3747_v41 = vld [vmem:[%s4181_s9 + $0x36c] ss:$16 sps:$4 sm:$0xff]  }
 0x14a   : > { %1845 = vmatprep.mubr.bf16.mxu0 %v3691_v42  ;;  %2134 = vmatprep.mubr.bf16.mxu1 %v3693_v43 }
 0x151   : > { %1846 = vmatmul.mubr.bf16.gmra.mxu0 %v3695_v44  ;;  %2135 = vmatmul.mubr.bf16.gmra.mxu1 %v3696_v45  ;;  %v585_v45 = vld [vmem:[#allocation2 + $0x50] sm:$0xff] }
 0x152   : > { %1853 = vmatprep.mubr.bf16.mxu0 %v3697_v46  ;;  %2142 = vmatprep.mubr.bf16.mxu1 %v3699_v47 }
 0x159   : > { %1854 = vmatmul.mubr.bf16.gmra.mxu0 %v3701_v48  ;;  %2143 = vmatmul.mubr.bf16.gmra.mxu1 %v3702_v49 }
 0x15a   : > { %1861 = vmatprep.mubr.bf16.mxu0 %v3703_v50  ;;  %2150 = vmatprep.mubr.bf16.mxu1 %v3705_v51 }
 0x161   : > { %1862 = vmatmul.mubr.bf16.gmra.mxu0 %v3707_v52  ;;  %2151 = vmatmul.mubr.bf16.gmra.mxu1 %v3708_v53  ;;  %v3749_v52 = vld [vmem:[%s4181_s9 + $0x360] ss:$16 sps:$4 sm:$0xff]   ;;  %v586_v53 = vld [vmem:[#allocation2 + $0x168] sm:$0xff] }
 0x162   : > { %1869 = vmatprep.mubr.bf16.mxu0 %v3709_v54  ;;  %2158 = vmatprep.mubr.bf16.mxu1 %v3711_v55  ;;  %v3750_v55 = vld [vmem:[%s4181_s9 + $0x368] ss:$16 sps:$4 sm:$0xff]  }
 0x169   : > { %1870 = vmatmul.mubr.bf16.gmra.mxu0 %v3713_v56  ;;  %2159 = vmatmul.mubr.bf16.gmra.mxu1 %v3714_v57  ;;  %v3753_v56 = vld [vmem:[%s4181_s9 + $0x384] ss:$16 sps:$4 sm:$0xff]  }
 0x16a   : > { %1877 = vmatprep.mubr.bf16.mxu0 %v3715_v58  ;;  %2166 = vmatprep.mubr.bf16.mxu1 %v3717_v59  ;;  %v3756_v59 = vld [vmem:[%s4181_s9 + $0x38c] ss:$16 sps:$4 sm:$0xff]  }
 0x171   : > { %1878 = vmatmul.mubr.bf16.gmra.mxu0 %v3719_v60  ;;  %2167 = vmatmul.mubr.bf16.gmra.mxu1 %v3720_v61 }
 0x172   : > { %1885 = vmatprep.mubr.bf16.mxu0 %v3721_v62  ;;  %2174 = vmatprep.mubr.bf16.mxu1 %v3723_v63  ;;  %v587_v63 = vld [vmem:[#allocation2 + $0x130] sm:$0xff] }
 0x179   : > { %1886 = vmatmul.mubr.bf16.gmra.mxu0 %v3725_v0  ;;  %2175 = vmatmul.mubr.bf16.gmra.mxu1 %v3726_v1 }
 0x17a   : > { %1893 = vmatprep.mubr.bf16.mxu0 %v3727_v2  ;;  %2182 = vmatprep.mubr.bf16.mxu1 %v3729_v3 }
 0x181   : > { %v1703_v8 = vpop.f32.mrf.mxu0  ;;  %1894 = vmatmul.mubr.bf16.gmra.mxu0 %v3731_v4  ;;  %v1992_v10 = vpop.f32.mrf.mxu1  ;;  %2183 = vmatmul.mubr.bf16.gmra.mxu1 %v3732_v5 }
 0x182   : > { %1901 = vmatprep.mubr.bf16.mxu0 %v3733_v6  ;;  %v1993_v11 = vadd.f32 %v1992_v10, %v1703_v8  ;;  %2190 = vmatprep.mubr.bf16.mxu1 %v3735_v7  ;;  %v3751_v6 = vld [vmem:[%s4181_s9 + $0x380] ss:$16 sps:$4 sm:$0xff]   ;;  %v588_v7 = vld [vmem:[#allocation2 + $0x48] sm:$0xff]  ;;  %v3759_v10 = vld [vmem:[%s4181_s9 + $0x3a4] ss:$16 sps:$4 sm:$0xff]  }
 0x183   : > { %v1705_v12 = vpop.f32.mrf.mxu0  ;;  %v1994_v13 = vpop.f32.mrf.mxu1 }
 0x184   : > { %v2247_v14 = vadd.f32 %v1993_v11, %v581_v9  ;;  %v3754_v9 = vld [vmem:[%s4181_s9 + $0x388] ss:$16 sps:$4 sm:$0xff]   ;;  %v3762_v13 = vld [vmem:[%s4181_s9 + $0x3ac] ss:$16 sps:$4 sm:$0xff]  }
 0x185   : > { %v1706_v15 = vpop.f32.mrf.mxu0  ;;  %v1995_v18 = vpop.f32.mrf.mxu1 }
 0x186   : > { %2311 = vst [vmem:[#allocation2 + $0xb0] sm:$0xff] %v2247_v14  ;;  %v1996_v21 = vadd.f32 %v1995_v18, %v1706_v15 }
 0x187   : > { %v1708_v22 = vpop.f32.mrf.mxu0  ;;  %v1997_v24 = vpop.f32.mrf.mxu1 }
 0x188   : > { %v2248_v25 = vadd.f32 %v1996_v21, %v582_v17  ;;  %v589_v17 = vld [vmem:[#allocation2 + $0x180] sm:$0xff] }
 0x189   : > { %v1711_v26 = vpop.f32.mrf.mxu0  ;;  %1902 = vmatmul.mubr.bf16.gmra.mxu0 %v3737_v16  ;;  %v2000_v28 = vpop.f32.mrf.mxu1  ;;  %2191 = vmatmul.mubr.bf16.gmra.mxu1 %v3738_v19  ;;  %v3757_v24 = vld [vmem:[%s4181_s9 + $0x3a0] ss:$16 sps:$4 sm:$0xff]  }
 0x18a   : > { %1909 = vmatprep.mubr.bf16.mxu0 %v3739_v20  ;;  %2312 = vst [vmem:[#allocation2 + $0x1b0] sm:$0xff] %v2248_v25  ;;  %v2001_v29 = vadd.f32 %v2000_v28, %v1711_v26  ;;  %2198 = vmatprep.mubr.bf16.mxu1 %v3741_v23  ;;  %v590_v25 = vld [vmem:[#allocation2 + $0x110] sm:$0xff] }
 0x18b   : > { %v1713_v30 = vpop.f32.mrf.mxu0  ;;  %v2002_v31 = vpop.f32.mrf.mxu1  ;;  %v3765_v28 = vld [vmem:[%s4181_s9 + $0x3c4] ss:$16 sps:$4 sm:$0xff]  }
 0x18c   : > { %v2249_v32 = vadd.f32 %v2001_v29, %v583_v27  ;;  %v3760_v27 = vld [vmem:[%s4181_s9 + $0x3a8] ss:$16 sps:$4 sm:$0xff]   ;;  %v3768_v31 = vld [vmem:[%s4181_s9 + $0x3cc] ss:$16 sps:$4 sm:$0xff]  }
 0x18d   : > { %v1714_v33 = vpop.f32.mrf.mxu0  ;;  %v2003_v36 = vpop.f32.mrf.mxu1 }
 0x18e   : > { %2313 = vst [vmem:[#allocation2 + $0xd8] sm:$0xff] %v2249_v32  ;;  %v2004_v39 = vadd.f32 %v2003_v36, %v1714_v33 }
 0x18f   : > { %v1716_v40 = vpop.f32.mrf.mxu0  ;;  %v2005_v42 = vpop.f32.mrf.mxu1 }
 0x190   : > { %v2250_v43 = vadd.f32 %v2004_v39, %v584_v35  ;;  %v591_v35 = vld [vmem:[#allocation2 + $0x118] sm:$0xff]  ;;  %v3763_v42 = vld [vmem:[%s4181_s9 + $0x3c0] ss:$16 sps:$4 sm:$0xff]  }
 0x191   : > { %v1719_v44 = vpop.f32.mrf.mxu0  ;;  %1910 = vmatmul.mubr.bf16.gmra.mxu0 %v3743_v34  ;;  %v2008_v46 = vpop.f32.mrf.mxu1  ;;  %2199 = vmatmul.mubr.bf16.gmra.mxu1 %v3744_v37 }
 0x192   : > { %1917 = vmatprep.mubr.bf16.mxu0 %v3745_v38  ;;  %2314 = vst [vmem:[#allocation2 + $0x18] sm:$0xff] %v2250_v43  ;;  %v2009_v47 = vadd.f32 %v2008_v46, %v1719_v44  ;;  %2206 = vmatprep.mubr.bf16.mxu1 %v3747_v41  ;;  %v592_v43 = vld [vmem:[#allocation2 + $0x98] sm:$0xff]  ;;  %v3771_v46 = vld [vmem:[%s4181_s9 + $0x3e4] ss:$16 sps:$4 sm:$0xff]  }
 0x193   : > { %v1721_v48 = vpop.f32.mrf.mxu0  ;;  %v2010_v49 = vpop.f32.mrf.mxu1 }
 0x194   : > { %v2251_v50 = vadd.f32 %v2009_v47, %v585_v45  ;;  %v3766_v45 = vld [vmem:[%s4181_s9 + $0x3c8] ss:$16 sps:$4 sm:$0xff]   ;;  %v3774_v49 = vld [vmem:[%s4181_s9 + $0x3ec] ss:$16 sps:$4 sm:$0xff]  }
 0x195   : > { %v1722_v51 = vpop.f32.mrf.mxu0  ;;  %v2011_v54 = vpop.f32.mrf.mxu1 }
 0x196   : > { %2315 = vst [vmem:[#allocation2 + $0x50] sm:$0xff] %v2251_v50  ;;  %v2012_v57 = vadd.f32 %v2011_v54, %v1722_v51 }
 0x197   : > { %v1724_v58 = vpop.f32.mrf.mxu0  ;;  %v2013_v60 = vpop.f32.mrf.mxu1 }
 0x198   : > { %v2252_v61 = vadd.f32 %v2012_v57, %v586_v53  ;;  %v593_v53 = vld [vmem:[#allocation2 + $0x120] sm:$0xff] }
 0x199   : > { %v1727_v62 = vpop.f32.mrf.mxu0  ;;  %1918 = vmatmul.mubr.bf16.gmra.mxu0 %v3749_v52  ;;  %v2016_v0 = vpop.f32.mrf.mxu1  ;;  %2207 = vmatmul.mubr.bf16.gmra.mxu1 %v3750_v55  ;;  %v3769_v60 = vld [vmem:[%s4181_s9 + $0x3e0] ss:$16 sps:$4 sm:$0xff]  }
 0x19a   : > { %1925 = vmatprep.mubr.bf16.mxu0 %v3753_v56  ;;  %2316 = vst [vmem:[#allocation2 + $0x168] sm:$0xff] %v2252_v61  ;;  %v2017_v1 = vadd.f32 %v2016_v0, %v1727_v62  ;;  %2214 = vmatprep.mubr.bf16.mxu1 %v3756_v59  ;;  %v594_v61 = vld [vmem:[#allocation2 + $0x150] sm:$0xff] }
 0x19b   : > { %v1729_v2 = vpop.f32.mrf.mxu0  ;;  %v2018_v3 = vpop.f32.mrf.mxu1 }
 0x19c   : > { %v2253_v4 = vadd.f32 %v2017_v1, %v587_v63  ;;  %v3772_v63 = vld [vmem:[%s4181_s9 + $0x3e8] ss:$16 sps:$4 sm:$0xff]  }
 0x19d   : > { %v1730_v5 = vpop.f32.mrf.mxu0  ;;  %v2019_v8 = vpop.f32.mrf.mxu1 }
 0x19e   : > { %2317 = vst [vmem:[#allocation2 + $0x130] sm:$0xff] %v2253_v4  ;;  %v2020_v11 = vadd.f32 %v2019_v8, %v1730_v5  ;;  %v595_v5 = vld [vmem:[#allocation2 + $0x108] sm:$0xff] }
 0x19f   : > { %v1732_v12 = vpop.f32.mrf.mxu0  ;;  %v2021_v14 = vpop.f32.mrf.mxu1 }
 0x1a0   : > { %v2254_v15 = vadd.f32 %v2020_v11, %v588_v7  ;;  %v596_v12 = vld [vmem:[#allocation2 + $0x60] sm:$0xff] }
 0x1a1   : > { %v1735_v16 = vpop.f32.mrf.mxu0  ;;  %1926 = vmatmul.mubr.bf16.gmra.mxu0 %v3751_v6  ;;  %v2024_v18 = vpop.f32.mrf.mxu1  ;;  %2215 = vmatmul.mubr.bf16.gmra.mxu1 %v3754_v9 }
 0x1a2   : > { %1933 = vmatprep.mubr.bf16.mxu0 %v3759_v10  ;;  %2318 = vst [vmem:[#allocation2 + $0x48] sm:$0xff] %v2254_v15  ;;  %v2025_v19 = vadd.f32 %v2024_v18, %v1735_v16  ;;  %2222 = vmatprep.mubr.bf16.mxu1 %v3762_v13 }
 0x1a3   : > { %v1737_v20 = vpop.f32.mrf.mxu0  ;;  %v2026_v21 = vpop.f32.mrf.mxu1 }
 0x1a4   : > { %v2255_v22 = vadd.f32 %v2025_v19, %v589_v17  ;;  %v597_v19 = vld [vmem:[#allocation2 + $0xe0] sm:$0xff] }
 0x1a5   : > { %v1738_v23 = vpop.f32.mrf.mxu0  ;;  %v2027_v26 = vpop.f32.mrf.mxu1 }
 0x1a6   : > { %2319 = vst [vmem:[#allocation2 + $0x180] sm:$0xff] %v2255_v22  ;;  %v2028_v29 = vadd.f32 %v2027_v26, %v1738_v23  ;;  %v598_v26 = vld [vmem:[#allocation2 + $0x188] sm:$0xff] }
 0x1a7   : > { %v1740_v30 = vpop.f32.mrf.mxu0  ;;  %v2029_v32 = vpop.f32.mrf.mxu1 }
 0x1a8   : > { %v2256_v33 = vadd.f32 %v2028_v29, %v590_v25 }
 0x1a9   : > { %v1743_v34 = vpop.f32.mrf.mxu0  ;;  %1934 = vmatmul.mubr.bf16.gmra.mxu0 %v3757_v24  ;;  %v2032_v36 = vpop.f32.mrf.mxu1  ;;  %2223 = vmatmul.mubr.bf16.gmra.mxu1 %v3760_v27 }
 0x1aa   : > { %1941 = vmatprep.mubr.bf16.mxu0 %v3765_v28  ;;  %2320 = vst [vmem:[#allocation2 + $0x110] sm:$0xff] %v2256_v33  ;;  %v2033_v37 = vadd.f32 %v2032_v36, %v1743_v34  ;;  %2230 = vmatprep.mubr.bf16.mxu1 %v3768_v31  ;;  %v599_v33 = vld [vmem:[#allocation2 + $0x138] sm:$0xff] }
 0x1ab   : > { %v1745_v38 = vpop.f32.mrf.mxu0  ;;  %v2034_v39 = vpop.f32.mrf.mxu1 }
 0x1ac   : > { %v2257_v40 = vadd.f32 %v2033_v37, %v591_v35 }
 0x1ad   : > { %v1746_v41 = vpop.f32.mrf.mxu0  ;;  %v2035_v44 = vpop.f32.mrf.mxu1 }
 0x1ae   : > { %2321 = vst [vmem:[#allocation2 + $0x118] sm:$0xff] %v2257_v40  ;;  %v2036_v47 = vadd.f32 %v2035_v44, %v1746_v41  ;;  %v600_v40 = vld [vmem:[#allocation2 + $0x140] sm:$0xff] }
 0x1af   : > { %v1748_v48 = vpop.f32.mrf.mxu0  ;;  %v2037_v50 = vpop.f32.mrf.mxu1 }
 0x1b0   : > { %v2258_v51 = vadd.f32 %v2036_v47, %v592_v43  ;;  %v601_v47 = vld [vmem:[#allocation2 + $0x80] sm:$0xff] }
 0x1b1   : > { %v1751_v52 = vpop.f32.mrf.mxu0  ;;  %1942 = vmatmul.mubr.bf16.gmra.mxu0 %v3763_v42  ;;  %v2040_v54 = vpop.f32.mrf.mxu1  ;;  %2231 = vmatmul.mubr.bf16.gmra.mxu1 %v3766_v45 }
 0x1b2   : > { %1949 = vmatprep.mubr.bf16.mxu0 %v3771_v46  ;;  %2322 = vst [vmem:[#allocation2 + $0x98] sm:$0xff] %v2258_v51  ;;  %v2041_v55 = vadd.f32 %v2040_v54, %v1751_v52  ;;  %2238 = vmatprep.mubr.bf16.mxu1 %v3774_v49  ;;  %v602_v54 = vld [vmem:[#allocation2 + $0x1a8] sm:$0xff] }
 0x1b3   : > { %v1753_v56 = vpop.f32.mrf.mxu0  ;;  %v2042_v57 = vpop.f32.mrf.mxu1 }
 0x1b4   : > { %v2259_v58 = vadd.f32 %v2041_v55, %v593_v53 }
 0x1b5   : > { %v1754_v59 = vpop.f32.mrf.mxu0  ;;  %v2043_v62 = vpop.f32.mrf.mxu1 }
 0x1b6   : > { %2323 = vst [vmem:[#allocation2 + $0x120] sm:$0xff] %v2259_v58  ;;  %v2044_v0 = vadd.f32 %v2043_v62, %v1754_v59 }
 0x1b7   : > { %v1756_v1 = vpop.f32.mrf.mxu0  ;;  %v2045_v2 = vpop.f32.mrf.mxu1 }
 0x1b8   : > { %v2260_v3 = vadd.f32 %v2044_v0, %v594_v61  ;;  %v603_v61 = vld [vmem:[#allocation2 + $0x1b8] sm:$0xff] }
 0x1b9   : > { %v1759_v4 = vpop.f32.mrf.mxu0  ;;  %1950 = vmatmul.mubr.bf16.gmra.mxu0 %v3769_v60  ;;  %v2048_v6 = vpop.f32.mrf.mxu1  ;;  %2239 = vmatmul.mubr.bf16.gmra.mxu1 %v3772_v63 }
 0x1ba   : > { %2324 = vst [vmem:[#allocation2 + $0x150] sm:$0xff] %v2260_v3  ;;  %v2049_v7 = vadd.f32 %v2048_v6, %v1759_v4  ;;  %v604_v4 = vld [vmem:[#allocation2 + $0x28] sm:$0xff] }
 0x1bb   : > { %v1761_v8 = vpop.f32.mrf.mxu0  ;;  %v2050_v9 = vpop.f32.mrf.mxu1 }
 0x1bc   : > { %v2261_v10 = vadd.f32 %v2049_v7, %v595_v5 }
 0x1bd   : > { %v1762_v11 = vpop.f32.mrf.mxu0  ;;  %v2051_v13 = vpop.f32.mrf.mxu1 }
 0x1be   : > { %2325 = vst [vmem:[#allocation2 + $0x108] sm:$0xff] %v2261_v10  ;;  %v2052_v14 = vadd.f32 %v2051_v13, %v1762_v11  ;;  %v605_v11 = vld [vmem:[#allocation2 + $0x1e8] sm:$0xff] }
 0x1bf   : > { %v1764_v15 = vpop.f32.mrf.mxu0  ;;  %v2053_v16 = vpop.f32.mrf.mxu1 }
 0x1c0   : > { %v2262_v17 = vadd.f32 %v2052_v14, %v596_v12 }
 0x1c1   : > { %v1767_v18 = vpop.f32.mrf.mxu0  ;;  %v2056_v20 = vpop.f32.mrf.mxu1 }
 0x1c2   : > { %2326 = vst [vmem:[#allocation2 + $0x60] sm:$0xff] %v2262_v17  ;;  %v2057_v21 = vadd.f32 %v2056_v20, %v1767_v18  ;;  %v606_v18 = vld [vmem:[#allocation2 + $0xf8] sm:$0xff] }
 0x1c3   : > { %v1769_v22 = vpop.f32.mrf.mxu0  ;;  %v2058_v23 = vpop.f32.mrf.mxu1 }
 0x1c4   : > { %v2263_v24 = vadd.f32 %v2057_v21, %v597_v19 }
 0x1c5   : > { %v1770_v25 = vpop.f32.mrf.mxu0  ;;  %v2059_v27 = vpop.f32.mrf.mxu1 }
 0x1c6   : > { %2327 = vst [vmem:[#allocation2 + $0xe0] sm:$0xff] %v2263_v24  ;;  %v2060_v28 = vadd.f32 %v2059_v27, %v1770_v25  ;;  %v607_v25 = vld [vmem:[#allocation2 + $0x160] sm:$0xff] }
 0x1c7   : > { %v1772_v29 = vpop.f32.mrf.mxu0  ;;  %v2061_v30 = vpop.f32.mrf.mxu1 }
 0x1c8   : > { %v2264_v31 = vadd.f32 %v2060_v28, %v598_v26 }
 0x1c9   : > { %v1775_v32 = vpop.f32.mrf.mxu0  ;;  %v2064_v34 = vpop.f32.mrf.mxu1 }
 0x1ca   : > { %2328 = vst [vmem:[#allocation2 + $0x188] sm:$0xff] %v2264_v31  ;;  %v2065_v35 = vadd.f32 %v2064_v34, %v1775_v32  ;;  %v608_v32 = vld [vmem:[#allocation2 + $0x30] sm:$0xff] }
 0x1cb   : > { %v1777_v36 = vpop.f32.mrf.mxu0  ;;  %v2066_v37 = vpop.f32.mrf.mxu1 }
 0x1cc   : > { %v2265_v38 = vadd.f32 %v2065_v35, %v599_v33 }
 0x1cd   : > { %v1778_v39 = vpop.f32.mrf.mxu0  ;;  %v2067_v41 = vpop.f32.mrf.mxu1 }
 0x1ce   : > { %2329 = vst [vmem:[#allocation2 + $0x138] sm:$0xff] %v2265_v38  ;;  %v2068_v42 = vadd.f32 %v2067_v41, %v1778_v39  ;;  %v609_v39 = vld [vmem:[#allocation2 + $0x1e0] sm:$0xff] }
 0x1cf   : > { %v1780_v43 = vpop.f32.mrf.mxu0  ;;  %v2069_v44 = vpop.f32.mrf.mxu1 }
 0x1d0   : > { %v2266_v45 = vadd.f32 %v2068_v42, %v600_v40 }
 0x1d1   : > { %v1783_v46 = vpop.f32.mrf.mxu0  ;;  %v2072_v48 = vpop.f32.mrf.mxu1 }
 0x1d2   : > { %2330 = vst [vmem:[#allocation2 + $0x140] sm:$0xff] %v2266_v45  ;;  %v2073_v49 = vadd.f32 %v2072_v48, %v1783_v46  ;;  %v610_v46 = vld [vmem:[#allocation2] sm:$0xff] }
 0x1d3   : > { %v1785_v50 = vpop.f32.mrf.mxu0  ;;  %v2074_v51 = vpop.f32.mrf.mxu1 }
 0x1d4   : > { %v2267_v52 = vadd.f32 %v2073_v49, %v601_v47 }
 0x1d5   : > { %v1786_v53 = vpop.f32.mrf.mxu0  ;;  %v2075_v55 = vpop.f32.mrf.mxu1 }
 0x1d6   : > { %2331 = vst [vmem:[#allocation2 + $0x80] sm:$0xff] %v2267_v52  ;;  %v2076_v56 = vadd.f32 %v2075_v55, %v1786_v53  ;;  %v611_v53 = vld [vmem:[#allocation2 + $0xf0] sm:$0xff] }
 0x1d7   : > { %v1788_v57 = vpop.f32.mrf.mxu0  ;;  %v2077_v58 = vpop.f32.mrf.mxu1 }
 0x1d8   : > { %v2268_v59 = vadd.f32 %v2076_v56, %v602_v54 }
 0x1d9   : > { %v1791_v60 = vpop.f32.mrf.mxu0  ;;  %v2080_v62 = vpop.f32.mrf.mxu1 }
 0x1da   : > { %2332 = vst [vmem:[#allocation2 + $0x1a8] sm:$0xff] %v2268_v59  ;;  %v2081_v63 = vadd.f32 %v2080_v62, %v1791_v60  ;;  %v612_v60 = vld [vmem:[#allocation2 + $0x8] sm:$0xff] }
 0x1db   : > { %v1793_v0 = vpop.f32.mrf.mxu0  ;;  %v2082_v1 = vpop.f32.mrf.mxu1 }
 0x1dc   : > { %v2269_v2 = vadd.f32 %v2081_v63, %v603_v61 }
 0x1dd   : > { %v1794_v3 = vpop.f32.mrf.mxu0  ;;  %v2083_v5 = vpop.f32.mrf.mxu1 }
 0x1de   : > { %2333 = vst [vmem:[#allocation2 + $0x1b8] sm:$0xff] %v2269_v2  ;;  %v2084_v6 = vadd.f32 %v2083_v5, %v1794_v3  ;;  %v613_v3 = vld [vmem:[#allocation2 + $0x148] sm:$0xff] }
 0x1df   : > { %v1796_v7 = vpop.f32.mrf.mxu0  ;;  %v2085_v8 = vpop.f32.mrf.mxu1 }
 0x1e0   : > { %v2270_v9 = vadd.f32 %v2084_v6, %v604_v4 }
 0x1e1   : > { %v1799_v10 = vpop.f32.mrf.mxu0  ;;  %v2088_v12 = vpop.f32.mrf.mxu1 }
 0x1e2   : > { %2334 = vst [vmem:[#allocation2 + $0x28] sm:$0xff] %v2270_v9  ;;  %v2089_v13 = vadd.f32 %v2088_v12, %v1799_v10  ;;  %v614_v10 = vld [vmem:[#allocation2 + $0x1d0] sm:$0xff] }
 0x1e3   : > { %v1801_v14 = vpop.f32.mrf.mxu0  ;;  %v2090_v15 = vpop.f32.mrf.mxu1 }
 0x1e4   : > { %v2271_v16 = vadd.f32 %v2089_v13, %v605_v11 }
 0x1e5   : > { %v1802_v17 = vpop.f32.mrf.mxu0  ;;  %v2091_v19 = vpop.f32.mrf.mxu1 }
 0x1e6   : > { %2335 = vst [vmem:[#allocation2 + $0x1e8] sm:$0xff] %v2271_v16  ;;  %v2092_v20 = vadd.f32 %v2091_v19, %v1802_v17  ;;  %v615_v17 = vld [vmem:[#allocation2 + $0x100] sm:$0xff] }
 0x1e7   : > { %v1804_v21 = vpop.f32.mrf.mxu0  ;;  %v2093_v22 = vpop.f32.mrf.mxu1 }
 0x1e8   : > { %v2272_v23 = vadd.f32 %v2092_v20, %v606_v18 }
 0x1e9   : > { %v1807_v24 = vpop.f32.mrf.mxu0  ;;  %v2096_v26 = vpop.f32.mrf.mxu1 }
 0x1ea   : > { %2336 = vst [vmem:[#allocation2 + $0xf8] sm:$0xff] %v2272_v23  ;;  %v2097_v27 = vadd.f32 %v2096_v26, %v1807_v24  ;;  %v616_v24 = vld [vmem:[#allocation2 + $0xc8] sm:$0xff] }
 0x1eb   : > { %v1809_v28 = vpop.f32.mrf.mxu0  ;;  %v2098_v29 = vpop.f32.mrf.mxu1 }
 0x1ec   : > { %v2273_v30 = vadd.f32 %v2097_v27, %v607_v25 }
 0x1ed   : > { %v1810_v31 = vpop.f32.mrf.mxu0  ;;  %v2099_v33 = vpop.f32.mrf.mxu1 }
 0x1ee   : > { %2337 = vst [vmem:[#allocation2 + $0x160] sm:$0xff] %v2273_v30  ;;  %v2100_v34 = vadd.f32 %v2099_v33, %v1810_v31  ;;  %v617_v31 = vld [vmem:[#allocation2 + $0x40] sm:$0xff] }
 0x1ef   : > { %v1812_v35 = vpop.f32.mrf.mxu0  ;;  %v2101_v36 = vpop.f32.mrf.mxu1 }
 0x1f0   : > { %v2274_v37 = vadd.f32 %v2100_v34, %v608_v32 }
 0x1f1   : > { %v1815_v38 = vpop.f32.mrf.mxu0  ;;  %v2104_v40 = vpop.f32.mrf.mxu1 }
 0x1f2   : > { %2338 = vst [vmem:[#allocation2 + $0x30] sm:$0xff] %v2274_v37  ;;  %v2105_v41 = vadd.f32 %v2104_v40, %v1815_v38  ;;  %v618_v38 = vld [vmem:[#allocation2 + $0x1f8] sm:$0xff] }
 0x1f3   : > { %v1817_v42 = vpop.f32.mrf.mxu0  ;;  %v2106_v43 = vpop.f32.mrf.mxu1 }
 0x1f4   : > { %v2275_v44 = vadd.f32 %v2105_v41, %v609_v39 }
 0x1f5   : > { %v1818_v45 = vpop.f32.mrf.mxu0  ;;  %v2107_v47 = vpop.f32.mrf.mxu1 }
 0x1f6   : > { %2339 = vst [vmem:[#allocation2 + $0x1e0] sm:$0xff] %v2275_v44  ;;  %v2108_v48 = vadd.f32 %v2107_v47, %v1818_v45  ;;  %v619_v45 = vld [vmem:[#allocation2 + $0x20] sm:$0xff] }
 0x1f7   : > { %v1820_v49 = vpop.f32.mrf.mxu0  ;;  %v2109_v50 = vpop.f32.mrf.mxu1 }
 0x1f8   : > { %v2276_v51 = vadd.f32 %v2108_v48, %v610_v46 }
 0x1f9   : > { %v1823_v52 = vpop.f32.mrf.mxu0  ;;  %v2112_v54 = vpop.f32.mrf.mxu1 }
 0x1fa   : > { %2340 = vst [vmem:[#allocation2] sm:$0xff] %v2276_v51  ;;  %v2113_v55 = vadd.f32 %v2112_v54, %v1823_v52  ;;  %v620_v52 = vld [vmem:[#allocation2 + $0x128] sm:$0xff] }
 0x1fb   : > { %v1825_v56 = vpop.f32.mrf.mxu0  ;;  %v2114_v57 = vpop.f32.mrf.mxu1 }
 0x1fc   : > { %v2277_v58 = vadd.f32 %v2113_v55, %v611_v53 }
 0x1fd   : > { %v1826_v59 = vpop.f32.mrf.mxu0  ;;  %v2115_v61 = vpop.f32.mrf.mxu1 }
 0x1fe   : > { %2341 = vst [vmem:[#allocation2 + $0xf0] sm:$0xff] %v2277_v58  ;;  %v2116_v62 = vadd.f32 %v2115_v61, %v1826_v59  ;;  %v621_v59 = vld [vmem:[#allocation2 + $0x1a0] sm:$0xff] }
 0x1ff   : > { %v1828_v63 = vpop.f32.mrf.mxu0  ;;  %v2117_v0 = vpop.f32.mrf.mxu1 }
 0x200   : > { %v2278_v1 = vadd.f32 %v2116_v62, %v612_v60 }
 0x201   : > { %v1831_v2 = vpop.f32.mrf.mxu0  ;;  %v2120_v4 = vpop.f32.mrf.mxu1 }
 0x202   : > { %2342 = vst [vmem:[#allocation2 + $0x8] sm:$0xff] %v2278_v1  ;;  %v2121_v5 = vadd.f32 %v2120_v4, %v1831_v2  ;;  %v622_v2 = vld [vmem:[#allocation2 + $0x1f0] sm:$0xff] }
 0x203   : > { %v1833_v6 = vpop.f32.mrf.mxu0  ;;  %v2122_v7 = vpop.f32.mrf.mxu1 }
 0x204   : > { %v2279_v8 = vadd.f32 %v2121_v5, %v613_v3 }
 0x205   : > { %v1834_v9 = vpop.f32.mrf.mxu0  ;;  %v2123_v11 = vpop.f32.mrf.mxu1 }
 0x206   : > { %2343 = vst [vmem:[#allocation2 + $0x148] sm:$0xff] %v2279_v8  ;;  %v2124_v12 = vadd.f32 %v2123_v11, %v1834_v9  ;;  %v623_v9 = vld [vmem:[#allocation2 + $0xe8] sm:$0xff] }
 0x207   : > { %v1836_v13 = vpop.f32.mrf.mxu0  ;;  %v2125_v14 = vpop.f32.mrf.mxu1 }
 0x208   : > { %v2280_v15 = vadd.f32 %v2124_v12, %v614_v10 }
 0x209   : > { %v1839_v16 = vpop.f32.mrf.mxu0  ;;  %v2128_v18 = vpop.f32.mrf.mxu1 }
 0x20a   : > { %2344 = vst [vmem:[#allocation2 + $0x1d0] sm:$0xff] %v2280_v15  ;;  %v2129_v19 = vadd.f32 %v2128_v18, %v1839_v16  ;;  %v624_v16 = vld [vmem:[#allocation2 + $0x78] sm:$0xff] }
 0x20b   : > { %v1841_v20 = vpop.f32.mrf.mxu0  ;;  %v2130_v21 = vpop.f32.mrf.mxu1 }
 0x20c   : > { %v2281_v22 = vadd.f32 %v2129_v19, %v615_v17 }
 0x20d   : > { %v1842_v23 = vpop.f32.mrf.mxu0  ;;  %v2131_v25 = vpop.f32.mrf.mxu1 }
 0x20e   : > { %2345 = vst [vmem:[#allocation2 + $0x100] sm:$0xff] %v2281_v22  ;;  %v2132_v26 = vadd.f32 %v2131_v25, %v1842_v23  ;;  %v625_v23 = vld [vmem:[#allocation2 + $0x70] sm:$0xff] }
 0x20f   : > { %v1844_v27 = vpop.f32.mrf.mxu0  ;;  %v2133_v28 = vpop.f32.mrf.mxu1 }
 0x210   : > { %v2282_v29 = vadd.f32 %v2132_v26, %v616_v24 }
 0x211   : > { %v1847_v30 = vpop.f32.mrf.mxu0  ;;  %v2136_v32 = vpop.f32.mrf.mxu1 }
 0x212   : > { %2346 = vst [vmem:[#allocation2 + $0xc8] sm:$0xff] %v2282_v29  ;;  %v2137_v33 = vadd.f32 %v2136_v32, %v1847_v30  ;;  %v626_v30 = vld [vmem:[#allocation2 + $0x90] sm:$0xff] }
 0x213   : > { %v1849_v34 = vpop.f32.mrf.mxu0  ;;  %v2138_v35 = vpop.f32.mrf.mxu1 }
 0x214   : > { %v2283_v36 = vadd.f32 %v2137_v33, %v617_v31 }
 0x215   : > { %v1850_v37 = vpop.f32.mrf.mxu0  ;;  %v2139_v39 = vpop.f32.mrf.mxu1 }
 0x216   : > { %2347 = vst [vmem:[#allocation2 + $0x40] sm:$0xff] %v2283_v36  ;;  %v2140_v40 = vadd.f32 %v2139_v39, %v1850_v37  ;;  %v627_v37 = vld [vmem:[#allocation2 + $0x1d8] sm:$0xff] }
 0x217   : > { %v1852_v41 = vpop.f32.mrf.mxu0  ;;  %v2141_v42 = vpop.f32.mrf.mxu1 }
 0x218   : > { %v2284_v43 = vadd.f32 %v2140_v40, %v618_v38 }
 0x219   : > { %v1855_v44 = vpop.f32.mrf.mxu0  ;;  %v2144_v46 = vpop.f32.mrf.mxu1 }
 0x21a   : > { %2348 = vst [vmem:[#allocation2 + $0x1f8] sm:$0xff] %v2284_v43  ;;  %v2145_v47 = vadd.f32 %v2144_v46, %v1855_v44  ;;  %v628_v44 = vld [vmem:[#allocation2 + $0xd0] sm:$0xff] }
 0x21b   : > { %v1857_v48 = vpop.f32.mrf.mxu0  ;;  %v2146_v49 = vpop.f32.mrf.mxu1 }
 0x21c   : > { %v2285_v50 = vadd.f32 %v2145_v47, %v619_v45 }
 0x21d   : > { %v1858_v51 = vpop.f32.mrf.mxu0  ;;  %v2147_v53 = vpop.f32.mrf.mxu1 }
 0x21e   : > { %2349 = vst [vmem:[#allocation2 + $0x20] sm:$0xff] %v2285_v50  ;;  %v2148_v54 = vadd.f32 %v2147_v53, %v1858_v51  ;;  %v629_v51 = vld [vmem:[#allocation2 + $0xb8] sm:$0xff] }
 0x21f   : > { %v1860_v55 = vpop.f32.mrf.mxu0  ;;  %v2149_v56 = vpop.f32.mrf.mxu1 }
 0x220   : > { %v2286_v57 = vadd.f32 %v2148_v54, %v620_v52 }
 0x221   : > { %v1863_v58 = vpop.f32.mrf.mxu0  ;;  %v2152_v60 = vpop.f32.mrf.mxu1 }
 0x222   : > { %2350 = vst [vmem:[#allocation2 + $0x128] sm:$0xff] %v2286_v57  ;;  %v2153_v61 = vadd.f32 %v2152_v60, %v1863_v58  ;;  %v630_v58 = vld [vmem:[#allocation2 + $0x88] sm:$0xff] }
 0x223   : > { %v1865_v62 = vpop.f32.mrf.mxu0  ;;  %v2154_v63 = vpop.f32.mrf.mxu1 }
 0x224   : > { %v2287_v0 = vadd.f32 %v2153_v61, %v621_v59 }
 0x225   : > { %v1866_v1 = vpop.f32.mrf.mxu0  ;;  %v2155_v3 = vpop.f32.mrf.mxu1 }
 0x226   : > { %2351 = vst [vmem:[#allocation2 + $0x1a0] sm:$0xff] %v2287_v0  ;;  %v2156_v4 = vadd.f32 %v2155_v3, %v1866_v1  ;;  %v631_v1 = vld [vmem:[#allocation2 + $0xa8] sm:$0xff] }
 0x227   : > { %v1868_v5 = vpop.f32.mrf.mxu0  ;;  %v2157_v6 = vpop.f32.mrf.mxu1 }
 0x228   : > { %v2288_v7 = vadd.f32 %v2156_v4, %v622_v2 }
 0x229   : > { %v1871_v8 = vpop.f32.mrf.mxu0  ;;  %v2160_v10 = vpop.f32.mrf.mxu1 }
 0x22a   : > { %2352 = vst [vmem:[#allocation2 + $0x1f0] sm:$0xff] %v2288_v7  ;;  %v2161_v11 = vadd.f32 %v2160_v10, %v1871_v8  ;;  %v632_v8 = vld [vmem:[#allocation2 + $0x1c8] sm:$0xff] }
 0x22b   : > { %v1873_v12 = vpop.f32.mrf.mxu0  ;;  %v2162_v13 = vpop.f32.mrf.mxu1 }
 0x22c   : > { %v2289_v14 = vadd.f32 %v2161_v11, %v623_v9 }
 0x22d   : > { %v1874_v15 = vpop.f32.mrf.mxu0  ;;  %v2163_v17 = vpop.f32.mrf.mxu1 }
 0x22e   : > { %2353 = vst [vmem:[#allocation2 + $0xe8] sm:$0xff] %v2289_v14  ;;  %v2164_v18 = vadd.f32 %v2163_v17, %v1874_v15  ;;  %v633_v15 = vld [vmem:[#allocation2 + $0x170] sm:$0xff] }
 0x22f   : > { %v1876_v19 = vpop.f32.mrf.mxu0  ;;  %v2165_v20 = vpop.f32.mrf.mxu1 }
 0x230   : > { %v2290_v21 = vadd.f32 %v2164_v18, %v624_v16 }
 0x231   : > { %v1879_v22 = vpop.f32.mrf.mxu0  ;;  %v2168_v24 = vpop.f32.mrf.mxu1 }
 0x232   : > { %2354 = vst [vmem:[#allocation2 + $0x78] sm:$0xff] %v2290_v21  ;;  %v2169_v25 = vadd.f32 %v2168_v24, %v1879_v22  ;;  %v634_v22 = vld [vmem:[#allocation2 + $0x178] sm:$0xff] }
 0x233   : > { %v1881_v26 = vpop.f32.mrf.mxu0  ;;  %v2170_v27 = vpop.f32.mrf.mxu1 }
 0x234   : > { %v2291_v28 = vadd.f32 %v2169_v25, %v625_v23 }
 0x235   : > { %v1882_v29 = vpop.f32.mrf.mxu0  ;;  %v2171_v31 = vpop.f32.mrf.mxu1 }
 0x236   : > { %2355 = vst [vmem:[#allocation2 + $0x70] sm:$0xff] %v2291_v28  ;;  %v2172_v32 = vadd.f32 %v2171_v31, %v1882_v29  ;;  %v635_v29 = vld [vmem:[#allocation2 + $0x68] sm:$0xff] }
 0x237   : > { %v1884_v33 = vpop.f32.mrf.mxu0  ;;  %v2173_v34 = vpop.f32.mrf.mxu1 }
 0x238   : > { %v2292_v35 = vadd.f32 %v2172_v32, %v626_v30 }
 0x239   : > { %v1887_v36 = vpop.f32.mrf.mxu0  ;;  %v2176_v38 = vpop.f32.mrf.mxu1 }
 0x23a   : > { %2356 = vst [vmem:[#allocation2 + $0x90] sm:$0xff] %v2292_v35  ;;  %v2177_v39 = vadd.f32 %v2176_v38, %v1887_v36  ;;  %v636_v36 = vld [vmem:[#allocation2 + $0x190] sm:$0xff] }
 0x23b   : > { %v1889_v40 = vpop.f32.mrf.mxu0  ;;  %v2178_v41 = vpop.f32.mrf.mxu1 }
 0x23c   : > { %v2293_v42 = vadd.f32 %v2177_v39, %v627_v37 }
 0x23d   : > { %v1890_v43 = vpop.f32.mrf.mxu0  ;;  %v2179_v45 = vpop.f32.mrf.mxu1 }
 0x23e   : > { %2357 = vst [vmem:[#allocation2 + $0x1d8] sm:$0xff] %v2293_v42  ;;  %v2180_v46 = vadd.f32 %v2179_v45, %v1890_v43  ;;  %v637_v43 = vld [vmem:[#allocation2 + $0x198] sm:$0xff] }
 0x23f   : > { %v1892_v47 = vpop.f32.mrf.mxu0  ;;  %v2181_v48 = vpop.f32.mrf.mxu1 }
 0x240   : > { %v2294_v49 = vadd.f32 %v2180_v46, %v628_v44 }
 0x241   : > { %v1895_v50 = vpop.f32.mrf.mxu0  ;;  %v2184_v52 = vpop.f32.mrf.mxu1 }
 0x242   : > { %2358 = vst [vmem:[#allocation2 + $0xd0] sm:$0xff] %v2294_v49  ;;  %v2185_v53 = vadd.f32 %v2184_v52, %v1895_v50  ;;  %v638_v50 = vld [vmem:[#allocation2 + $0x38] sm:$0xff] }
 0x243   : > { %v1897_v54 = vpop.f32.mrf.mxu0  ;;  %v2186_v55 = vpop.f32.mrf.mxu1 }
 0x244   : > { %v2295_v56 = vadd.f32 %v2185_v53, %v629_v51 }
 0x245   : > { %v1898_v57 = vpop.f32.mrf.mxu0  ;;  %v2187_v59 = vpop.f32.mrf.mxu1 }
 0x246   : > { %2359 = vst [vmem:[#allocation2 + $0xb8] sm:$0xff] %v2295_v56  ;;  %v2188_v60 = vadd.f32 %v2187_v59, %v1898_v57  ;;  %v639_v57 = vld [vmem:[#allocation2 + $0xc0] sm:$0xff] }
 0x247   : > { %v1900_v61 = vpop.f32.mrf.mxu0  ;;  %v2189_v62 = vpop.f32.mrf.mxu1 }
 0x248   : > { %v2296_v63 = vadd.f32 %v2188_v60, %v630_v58 }
 0x249   : > { %v1903_v0 = vpop.f32.mrf.mxu0  ;;  %v2192_v2 = vpop.f32.mrf.mxu1 }
 0x24a   : > { %2360 = vst [vmem:[#allocation2 + $0x88] sm:$0xff] %v2296_v63  ;;  %v2193_v3 = vadd.f32 %v2192_v2, %v1903_v0  ;;  %v640_v0 = vld [vmem:[#allocation2 + $0x1c0] sm:$0xff] }
 0x24b   : > { %v1905_v4 = vpop.f32.mrf.mxu0  ;;  %v2194_v5 = vpop.f32.mrf.mxu1 }
 0x24c   : > { %v2297_v6 = vadd.f32 %v2193_v3, %v631_v1 }
 0x24d   : > { %v1906_v7 = vpop.f32.mrf.mxu0  ;;  %v2195_v9 = vpop.f32.mrf.mxu1 }
 0x24e   : > { %2361 = vst [vmem:[#allocation2 + $0xa8] sm:$0xff] %v2297_v6  ;;  %v2196_v10 = vadd.f32 %v2195_v9, %v1906_v7  ;;  %v641_v7 = vld [vmem:[#allocation2 + $0x158] sm:$0xff] }
 0x24f   : > { %v1908_v11 = vpop.f32.mrf.mxu0  ;;  %v2197_v12 = vpop.f32.mrf.mxu1 }
 0x250   : > { %v2298_v13 = vadd.f32 %v2196_v10, %v632_v8 }
 0x251   : > { %v1911_v14 = vpop.f32.mrf.mxu0  ;;  %v2200_v16 = vpop.f32.mrf.mxu1 }
 0x252   : > { %2362 = vst [vmem:[#allocation2 + $0x1c8] sm:$0xff] %v2298_v13  ;;  %v2201_v17 = vadd.f32 %v2200_v16, %v1911_v14  ;;  %v642_v14 = vld [vmem:[#allocation2 + $0x10] sm:$0xff] }
 0x253   : > { %v1913_v18 = vpop.f32.mrf.mxu0  ;;  %v2202_v19 = vpop.f32.mrf.mxu1 }
 0x254   : > { %v2299_v20 = vadd.f32 %v2201_v17, %v633_v15 }
 0x255   : > { %v1914_v21 = vpop.f32.mrf.mxu0  ;;  %v2203_v23 = vpop.f32.mrf.mxu1 }
 0x256   : > { %2363 = vst [vmem:[#allocation2 + $0x170] sm:$0xff] %v2299_v20  ;;  %v2204_v24 = vadd.f32 %v2203_v23, %v1914_v21  ;;  %v643_v21 = vld [vmem:[#allocation2 + $0x58] sm:$0xff] }
 0x257   : > { %v1916_v25 = vpop.f32.mrf.mxu0  ;;  %v2205_v26 = vpop.f32.mrf.mxu1 }
 0x258   : > { %v2300_v27 = vadd.f32 %v2204_v24, %v634_v22 }
 0x259   : > { %v1919_v28 = vpop.f32.mrf.mxu0  ;;  %v2208_v30 = vpop.f32.mrf.mxu1 }
 0x25a   : > { %2364 = vst [vmem:[#allocation2 + $0x178] sm:$0xff] %v2300_v27  ;;  %v2209_v31 = vadd.f32 %v2208_v30, %v1919_v28  ;;  %v644_v28 = vld [vmem:[#allocation2 + $0xa0] sm:$0xff] }
 0x25b   : > { %v1921_v32 = vpop.f32.mrf.mxu0  ;;  %v2210_v33 = vpop.f32.mrf.mxu1 }
 0x25c   : > { %v2301_v34 = vadd.f32 %v2209_v31, %v635_v29 }
 0x25d   : > { %v1922_v35 = vpop.f32.mrf.mxu0  ;;  %v2211_v37 = vpop.f32.mrf.mxu1 }
 0x25e   : > { %2365 = vst [vmem:[#allocation2 + $0x68] sm:$0xff] %v2301_v34  ;;  %v2212_v38 = vadd.f32 %v2211_v37, %v1922_v35 }
 0x25f   : > { %v1924_v39 = vpop.f32.mrf.mxu0  ;;  %v2213_v40 = vpop.f32.mrf.mxu1 }
 0x260   : > { %v2302_v41 = vadd.f32 %v2212_v38, %v636_v36 }
 0x261   : > { %v1927_v42 = vpop.f32.mrf.mxu0  ;;  %v2216_v44 = vpop.f32.mrf.mxu1 }
 0x262   : > { %2366 = vst [vmem:[#allocation2 + $0x190] sm:$0xff] %v2302_v41  ;;  %v2217_v45 = vadd.f32 %v2216_v44, %v1927_v42 }
 0x263   : > { %v1929_v46 = vpop.f32.mrf.mxu0  ;;  %v2218_v47 = vpop.f32.mrf.mxu1 }
 0x264   : > { %v2303_v48 = vadd.f32 %v2217_v45, %v637_v43 }
 0x265   : > { %v1930_v49 = vpop.f32.mrf.mxu0  ;;  %v2219_v51 = vpop.f32.mrf.mxu1 }
 0x266   : > { %2367 = vst [vmem:[#allocation2 + $0x198] sm:$0xff] %v2303_v48  ;;  %v2220_v52 = vadd.f32 %v2219_v51, %v1930_v49 }
 0x267   : > { %v1932_v53 = vpop.f32.mrf.mxu0  ;;  %v2221_v54 = vpop.f32.mrf.mxu1 }
 0x268   : > { %v2304_v55 = vadd.f32 %v2220_v52, %v638_v50 }
 0x269   : > { %v1935_v56 = vpop.f32.mrf.mxu0  ;;  %v2224_v58 = vpop.f32.mrf.mxu1 }
 0x26a   : > { %2368 = vst [vmem:[#allocation2 + $0x38] sm:$0xff] %v2304_v55  ;;  %v2225_v59 = vadd.f32 %v2224_v58, %v1935_v56 }
 0x26b   : > { %v1937_v60 = vpop.f32.mrf.mxu0  ;;  %v2226_v61 = vpop.f32.mrf.mxu1 }
 0x26c   : > { %v2305_v62 = vadd.f32 %v2225_v59, %v639_v57 }
 0x26d   : > { %v1938_v63 = vpop.f32.mrf.mxu0  ;;  %v2227_v1 = vpop.f32.mrf.mxu1 }
 0x26e   : > { %2369 = vst [vmem:[#allocation2 + $0xc0] sm:$0xff] %v2305_v62  ;;  %v2228_v2 = vadd.f32 %v2227_v1, %v1938_v63 }
 0x26f   : > { %v1940_v3 = vpop.f32.mrf.mxu0  ;;  %v2229_v4 = vpop.f32.mrf.mxu1 }
 0x270   : > { %v2306_v5 = vadd.f32 %v2228_v2, %v640_v0 }
 0x271   : > { %v1943_v6 = vpop.f32.mrf.mxu0  ;;  %v2232_v8 = vpop.f32.mrf.mxu1 }
 0x272   : > { %2370 = vst [vmem:[#allocation2 + $0x1c0] sm:$0xff] %v2306_v5  ;;  %v2233_v9 = vadd.f32 %v2232_v8, %v1943_v6 }
 0x273   : > { %v1945_v10 = vpop.f32.mrf.mxu0  ;;  %v2234_v11 = vpop.f32.mrf.mxu1 }
 0x274   : > { %v2307_v12 = vadd.f32 %v2233_v9, %v641_v7 }
 0x275   : > { %v1946_v13 = vpop.f32.mrf.mxu0  ;;  %v2235_v15 = vpop.f32.mrf.mxu1 }
 0x276   : > { %2371 = vst [vmem:[#allocation2 + $0x158] sm:$0xff] %v2307_v12  ;;  %v2236_v16 = vadd.f32 %v2235_v15, %v1946_v13 }
 0x277   : > { %v1948_v17 = vpop.f32.mrf.mxu0  ;;  %v2237_v18 = vpop.f32.mrf.mxu1 }
 0x278   : > { %v2308_v19 = vadd.f32 %v2236_v16, %v642_v14 }
 0x279   : > { %v1951_v20 = vpop.f32.mrf.mxu0  ;;  %v2240_v22 = vpop.f32.mrf.mxu1 }
 0x27a   : > { %2372 = vst [vmem:[#allocation2 + $0x10] sm:$0xff] %v2308_v19  ;;  %v2241_v23 = vadd.f32 %v2240_v22, %v1951_v20 }
 0x27b   : > { %v1953_v24 = vpop.f32.mrf.mxu0  ;;  %v2242_v25 = vpop.f32.mrf.mxu1 }
 0x27c   : > { %v2309_v26 = vadd.f32 %v2241_v23, %v643_v21 }
 0x27d   : > { %v1954_v27 = vpop.f32.mrf.mxu0  ;;  %v2243_v29 = vpop.f32.mrf.mxu1 }
 0x27e   : > { %2373 = vst [vmem:[#allocation2 + $0x58] sm:$0xff] %v2309_v26  ;;  %v2244_v30 = vadd.f32 %v2243_v29, %v1954_v27  ;;  %2378 = sbr.rel (%p3174_p11) target bundleno = 689 (0x2b1), region = 63 }
 0x27f   : > { %v1956_v31 = vpop.f32.mrf.mxu0  ;;  %v2245_v32 = vpop.f32.mrf.mxu1 }
 0x280   : > { %v2310_v33 = vadd.f32 %v2244_v30, %v644_v28 }
 0x282   : > { %2374 = vst [vmem:[#allocation2 + $0xa0] sm:$0xff] %v2310_v33 }
 0x283   : > { %v2379_v34 = vld [vmem:[#allocation2 + $0xb0] sm:$0xff]  ;;  %v4444_v36 = vld [vmem:[%s4544_s2] ss:$0 sm:$0xff]  ;;  %v2381_v39 = vld [vmem:[#allocation2 + $0xd8] sm:$0xff] }
 0x284   : > { %v2380_v35 = vld [vmem:[#allocation2 + $0x1b0] sm:$0xff]  ;;  %v2450_v37 = vadd.f32 %v4444_v36, %v2379_v34  ;;  %v2382_v40 = vld [vmem:[#allocation2 + $0x18] sm:$0xff]  ;;  %v2452_v42 = vadd.f32 %v4444_v36, %v2381_v39  ;;  %v2384_v44 = vld [vmem:[#allocation2 + $0x168] sm:$0xff] }
 0x285   : > { %v2451_v38 = vadd.f32 %v4444_v36, %v2380_v35  ;;  %v2383_v41 = vld [vmem:[#allocation2 + $0x50] sm:$0xff]  ;;  %v2453_v43 = vadd.f32 %v4444_v36, %v2382_v40  ;;  %v2386_v47 = vld [vmem:[#allocation2 + $0x48] sm:$0xff]  ;;  %v2455_v50 = vadd.f32 %v4444_v36, %v2384_v44  ;;  %v2387_v52 = vld [vmem:[#allocation2 + $0x180] sm:$0xff] }
 0x286   : > { %v2454_v45 = vadd.f32 %v4444_v36, %v2383_v41  ;;  %v2385_v46 = vld [vmem:[#allocation2 + $0x130] sm:$0xff]  ;;  %v2514_v48 = vmax.f32 %v2450_v37, 0.0  ;;  %v2389_v54 = vld [vmem:[#allocation2 + $0x118] sm:$0xff]  ;;  %v2516_v55 = vmax.f32 %v2452_v42, 0.0  ;;  %v2457_v58 = vadd.f32 %v4444_v36, %v2386_v47  ;;  %v2391_v60 = vld [vmem:[#allocation2 + $0x120] sm:$0xff] }
 0x287   : > { %v2515_v49 = vmax.f32 %v2451_v38, 0.0  ;;  %v2456_v51 = vadd.f32 %v4444_v36, %v2385_v46  ;;  %v2388_v53 = vld [vmem:[#allocation2 + $0x110] sm:$0xff]  ;;  %v2517_v56 = vmax.f32 %v2453_v43, 0.0  ;;  %v2390_v59 = vld [vmem:[#allocation2 + $0x98] sm:$0xff]  ;;  %v2519_v62 = vmax.f32 %v2455_v50, 0.0  ;;  %v2393_v6 = vld [vmem:[#allocation2 + $0x108] sm:$0xff] }
 0x288   : > { %v2518_v57 = vmax.f32 %v2454_v45, 0.0  ;;  %v2458_v0 = vadd.f32 %v4444_v36, %v2387_v52  ;;  %v2392_v1 = vld [vmem:[#allocation2 + $0x150] sm:$0xff]  ;;  %v2521_v3 = vmax.f32 %v2457_v58, 0.0  ;;  %v2459_v4 = vadd.f32 %v4444_v36, %v2388_v53  ;;  %v2394_v7 = vld [vmem:[#allocation2 + $0x60] sm:$0xff]  ;;  %v2396_v13 = vld [vmem:[#allocation2 + $0x188] sm:$0xff] }
 0x289   : > { %v3312_v61 = vpack.c.bf16 %v2515_v49, %v2514_v48  ;;  %v2520_v63 = vmax.f32 %v2456_v51, 0.0  ;;  %v3317_v2 = vpack.c.bf16 %v2517_v56, %v2516_v55  ;;  %v2460_v5 = vadd.f32 %v4444_v36, %v2389_v54  ;;  %v2395_v12 = vld [vmem:[#allocation2 + $0xe0] sm:$0xff]  ;;  %v2397_v18 = vld [vmem:[#allocation2 + $0x138] sm:$0xff]  ;;  %v2400_v29 = vld [vmem:[#allocation2 + $0x1a8] sm:$0xff] }
 0x28a   : > { %v3322_v8 = vpack.c.bf16 %v2519_v62, %v2518_v57  ;;  %v2522_v9 = vmax.f32 %v2458_v0, 0.0  ;;  %v2461_v10 = vadd.f32 %v4444_v36, %v2390_v59  ;;  %v2462_v11 = vadd.f32 %v4444_v36, %v2391_v60  ;;  %v2398_v23 = vld [vmem:[#allocation2 + $0x140] sm:$0xff]  ;;  %v2401_v34 = vld [vmem:[#allocation2 + $0x1b8] sm:$0xff]  ;;  %v2402_v35 = vld [vmem:[#allocation2 + $0x28] sm:$0xff] }
 0x28b   : > { %3313 = vst [vmem:[#allocation4] sm:$0xff] %v3312_v61   ;;  %3469 = vst [vmem:[#allocation4 + $0x8] sm:$0xff] %v3317_v2   ;;  %v3327_v14 = vpack.c.bf16 %v2521_v3, %v2520_v63  ;;  %v2523_v15 = vmax.f32 %v2459_v4, 0.0  ;;  %v2524_v16 = vmax.f32 %v2460_v5, 0.0  ;;  %v2463_v17 = vadd.f32 %v4444_v36, %v2392_v1  ;;  %v2399_v28 = vld [vmem:[#allocation2 + $0x80] sm:$0xff]  ;;  %v2403_v41 = vld [vmem:[#allocation2 + $0x1e8] sm:$0xff] }
 0x28c   : > { %3470 = vst [vmem:[#allocation4 + $0x10] sm:$0xff] %v3322_v8   ;;  %v2525_v19 = vmax.f32 %v2461_v10, 0.0  ;;  %v2526_v20 = vmax.f32 %v2462_v11, 0.0  ;;  %v2464_v21 = vadd.f32 %v4444_v36, %v2393_v6  ;;  %v2465_v22 = vadd.f32 %v4444_v36, %v2394_v7  ;;  %v2404_v42 = vld [vmem:[#allocation2 + $0xf8] sm:$0xff]  ;;  %v2405_v47 = vld [vmem:[#allocation2 + $0x160] sm:$0xff]  ;;  %v2406_v52 = vld [vmem:[#allocation2 + $0x30] sm:$0xff] }
 0x28d   : > { %3471 = vst [vmem:[#allocation4 + $0x18] sm:$0xff] %v3327_v14   ;;  %v3332_v24 = vpack.c.bf16 %v2523_v15, %v2522_v9  ;;  %v2527_v25 = vmax.f32 %v2463_v17, 0.0  ;;  %v2466_v26 = vadd.f32 %v4444_v36, %v2395_v12  ;;  %v2467_v27 = vadd.f32 %v4444_v36, %v2396_v13  ;;  %v2407_v57 = vld [vmem:[#allocation2 + $0x1e0] sm:$0xff]  ;;  %v2409_v63 = vld [vmem:[#allocation2 + $0xf0] sm:$0xff]  ;;  %v2410_v0 = vld [vmem:[#allocation2 + $0x8] sm:$0xff] }
 0x28e   : > { %v3337_v30 = vpack.c.bf16 %v2525_v19, %v2524_v16  ;;  %v2528_v31 = vmax.f32 %v2464_v21, 0.0  ;;  %v2529_v32 = vmax.f32 %v2465_v22, 0.0  ;;  %v2468_v33 = vadd.f32 %v4444_v36, %v2397_v18  ;;  %v2408_v58 = vld [vmem:[#allocation2] sm:$0xff]  ;;  %v2411_v5 = vld [vmem:[#allocation2 + $0x148] sm:$0xff]  ;;  %v2412_v6 = vld [vmem:[#allocation2 + $0x1d0] sm:$0xff] }
 0x28f   : > { %3472 = vst [vmem:[#allocation4 + $0x20] sm:$0xff] %v3332_v24   ;;  %v3342_v37 = vpack.c.bf16 %v2527_v25, %v2526_v20  ;;  %v2530_v38 = vmax.f32 %v2466_v26, 0.0  ;;  %v2531_v39 = vmax.f32 %v2467_v27, 0.0  ;;  %v2469_v40 = vadd.f32 %v4444_v36, %v2398_v23  ;;  %v2413_v11 = vld [vmem:[#allocation2 + $0x100] sm:$0xff]  ;;  %v2414_v16 = vld [vmem:[#allocation2 + $0xc8] sm:$0xff]  ;;  %v2416_v22 = vld [vmem:[#allocation2 + $0x1f8] sm:$0xff] }
 0x290   : > { %3473 = vst [vmem:[#allocation4 + $0x28] sm:$0xff] %v3337_v30   ;;  %v3347_v43 = vpack.c.bf16 %v2529_v32, %v2528_v31  ;;  %v2532_v44 = vmax.f32 %v2468_v33, 0.0  ;;  %v2470_v45 = vadd.f32 %v4444_v36, %v2399_v28  ;;  %v2471_v46 = vadd.f32 %v4444_v36, %v2400_v29  ;;  %v2415_v21 = vld [vmem:[#allocation2 + $0x40] sm:$0xff]  ;;  %v2418_v28 = vld [vmem:[#allocation2 + $0x128] sm:$0xff] }
 0x291   : > { %3474 = vst [vmem:[#allocation4 + $0x30] sm:$0xff] %v3342_v37   ;;  %v3352_v48 = vpack.c.bf16 %v2531_v39, %v2530_v38  ;;  %v2533_v49 = vmax.f32 %v2469_v40, 0.0  ;;  %v2472_v50 = vadd.f32 %v4444_v36, %v2401_v34  ;;  %v2473_v51 = vadd.f32 %v4444_v36, %v2402_v35  ;;  %v2417_v27 = vld [vmem:[#allocation2 + $0x20] sm:$0xff]  ;;  %v2420_v34 = vld [vmem:[#allocation2 + $0x1f0] sm:$0xff]  ;;  %v2421_v40 = vld [vmem:[#allocation2 + $0xe8] sm:$0xff] }
 0x292   : > { %3475 = vst [vmem:[#allocation4 + $0x38] sm:$0xff] %v3347_v43   ;;  %v2534_v53 = vmax.f32 %v2470_v45, 0.0  ;;  %v2535_v54 = vmax.f32 %v2471_v46, 0.0  ;;  %v2474_v55 = vadd.f32 %v4444_v36, %v2403_v41  ;;  %v2475_v56 = vadd.f32 %v4444_v36, %v2404_v42  ;;  %v2419_v33 = vld [vmem:[#allocation2 + $0x1a0] sm:$0xff]  ;;  %v2422_v45 = vld [vmem:[#allocation2 + $0x78] sm:$0xff] }
 0x293   : > { %3476 = vst [vmem:[#allocation4 + $0x40] sm:$0xff] %v3352_v48   ;;  %v3357_v59 = vpack.c.bf16 %v2533_v49, %v2532_v44  ;;  %v2536_v60 = vmax.f32 %v2472_v50, 0.0  ;;  %v2537_v61 = vmax.f32 %v2473_v51, 0.0  ;;  %v2476_v62 = vadd.f32 %v4444_v36, %v2405_v47  ;;  %v2423_v50 = vld [vmem:[#allocation2 + $0x70] sm:$0xff] }
 0x294   : > { %v3362_v1 = vpack.c.bf16 %v2535_v54, %v2534_v53  ;;  %v2538_v2 = vmax.f32 %v2474_v55, 0.0  ;;  %v2539_v3 = vmax.f32 %v2475_v56, 0.0  ;;  %v2477_v4 = vadd.f32 %v4444_v36, %v2406_v52  ;;  %v2424_v51 = vld [vmem:[#allocation2 + $0x90] sm:$0xff]  ;;  %v2425_v56 = vld [vmem:[#allocation2 + $0x1d8] sm:$0xff] }
 0x295   : > { %3477 = vst [vmem:[#allocation4 + $0x48] sm:$0xff] %v3357_v59   ;;  %v3367_v7 = vpack.c.bf16 %v2537_v61, %v2536_v60  ;;  %v2540_v8 = vmax.f32 %v2476_v62, 0.0  ;;  %v2478_v9 = vadd.f32 %v4444_v36, %v2407_v57  ;;  %v2479_v10 = vadd.f32 %v4444_v36, %v2408_v58  ;;  %v2426_v57 = vld [vmem:[#allocation2 + $0xd0] sm:$0xff]  ;;  %v2427_v62 = vld [vmem:[#allocation2 + $0xb8] sm:$0xff] }
 0x296   : > { %3478 = vst [vmem:[#allocation4 + $0x50] sm:$0xff] %v3362_v1   ;;  %v3372_v12 = vpack.c.bf16 %v2539_v3, %v2538_v2  ;;  %v2541_v13 = vmax.f32 %v2477_v4, 0.0  ;;  %v2480_v14 = vadd.f32 %v4444_v36, %v2409_v63  ;;  %v2481_v15 = vadd.f32 %v4444_v36, %v2410_v0  ;;  %v2428_v63 = vld [vmem:[#allocation2 + $0x88] sm:$0xff] }
 0x297   : > { %3479 = vst [vmem:[#allocation4 + $0x58] sm:$0xff] %v3367_v7   ;;  %v2542_v17 = vmax.f32 %v2478_v9, 0.0  ;;  %v2543_v18 = vmax.f32 %v2479_v10, 0.0  ;;  %v2482_v19 = vadd.f32 %v4444_v36, %v2411_v5  ;;  %v2483_v20 = vadd.f32 %v4444_v36, %v2412_v6  ;;  %v2429_v4 = vld [vmem:[#allocation2 + $0xa8] sm:$0xff] }
 0x298   : > { %3480 = vst [vmem:[#allocation4 + $0x60] sm:$0xff] %v3372_v12   ;;  %v3377_v23 = vpack.c.bf16 %v2541_v13, %v2540_v8  ;;  %v2544_v24 = vmax.f32 %v2480_v14, 0.0  ;;  %v2545_v25 = vmax.f32 %v2481_v15, 0.0  ;;  %v2484_v26 = vadd.f32 %v4444_v36, %v2413_v11  ;;  %v2430_v9 = vld [vmem:[#allocation2 + $0x1c8] sm:$0xff]  ;;  %v2431_v14 = vld [vmem:[#allocation2 + $0x170] sm:$0xff]  ;;  %v2432_v15 = vld [vmem:[#allocation2 + $0x178] sm:$0xff] }
 0x299   : > { %v3382_v29 = vpack.c.bf16 %v2543_v18, %v2542_v17  ;;  %v2546_v30 = vmax.f32 %v2482_v19, 0.0  ;;  %v2547_v31 = vmax.f32 %v2483_v20, 0.0  ;;  %v2485_v32 = vadd.f32 %v4444_v36, %v2414_v16  ;;  %v2433_v20 = vld [vmem:[#allocation2 + $0x68] sm:$0xff] }
 0x29a   : > { %3481 = vst [vmem:[#allocation4 + $0x68] sm:$0xff] %v3377_v23   ;;  %v3387_v35 = vpack.c.bf16 %v2545_v25, %v2544_v24  ;;  %v2548_v37 = vmax.f32 %v2484_v26, 0.0  ;;  %v2486_v38 = vadd.f32 %v4444_v36, %v2415_v21  ;;  %v2487_v39 = vadd.f32 %v4444_v36, %v2416_v22  ;;  %v2434_v21 = vld [vmem:[#allocation2 + $0x190] sm:$0xff]  ;;  %v2435_v26 = vld [vmem:[#allocation2 + $0x198] sm:$0xff] }
 0x29b   : > { %3482 = vst [vmem:[#allocation4 + $0x70] sm:$0xff] %v3382_v29   ;;  %v3392_v41 = vpack.c.bf16 %v2547_v31, %v2546_v30  ;;  %v2549_v42 = vmax.f32 %v2485_v32, 0.0  ;;  %v2488_v43 = vadd.f32 %v4444_v36, %v2417_v27  ;;  %v2489_v44 = vadd.f32 %v4444_v36, %v2418_v28  ;;  %v2436_v27 = vld [vmem:[#allocation2 + $0x38] sm:$0xff]  ;;  %v2437_v32 = vld [vmem:[#allocation2 + $0xc0] sm:$0xff] }
 0x29c   : > { %3483 = vst [vmem:[#allocation4 + $0x78] sm:$0xff] %v3387_v35   ;;  %v2550_v46 = vmax.f32 %v2486_v38, 0.0  ;;  %v2551_v47 = vmax.f32 %v2487_v39, 0.0  ;;  %v2490_v48 = vadd.f32 %v4444_v36, %v2419_v33  ;;  %v2491_v49 = vadd.f32 %v4444_v36, %v2420_v34  ;;  %v2438_v38 = vld [vmem:[#allocation2 + $0x1c0] sm:$0xff] }
 0x29d   : > { %3484 = vst [vmem:[#allocation4 + $0x80] sm:$0xff] %v3392_v41   ;;  %v3397_v52 = vpack.c.bf16 %v2549_v42, %v2548_v37  ;;  %v2552_v53 = vmax.f32 %v2488_v43, 0.0  ;;  %v2553_v54 = vmax.f32 %v2489_v44, 0.0  ;;  %v2492_v55 = vadd.f32 %v4444_v36, %v2421_v40  ;;  %v2439_v43 = vld [vmem:[#allocation2 + $0x158] sm:$0xff]  ;;  %v2440_v44 = vld [vmem:[#allocation2 + $0x10] sm:$0xff] }
 0x29e   : > { %v3402_v58 = vpack.c.bf16 %v2551_v47, %v2550_v46  ;;  %v2554_v59 = vmax.f32 %v2490_v48, 0.0  ;;  %v2555_v60 = vmax.f32 %v2491_v49, 0.0  ;;  %v2493_v61 = vadd.f32 %v4444_v36, %v2422_v45  ;;  %v2441_v49 = vld [vmem:[#allocation2 + $0x58] sm:$0xff] }
 0x29f   : > { %3485 = vst [vmem:[#allocation4 + $0x88] sm:$0xff] %v3397_v52   ;;  %v3407_v0 = vpack.c.bf16 %v2553_v54, %v2552_v53  ;;  %v2556_v1 = vmax.f32 %v2492_v55, 0.0  ;;  %v2494_v2 = vadd.f32 %v4444_v36, %v2423_v50  ;;  %v2495_v3 = vadd.f32 %v4444_v36, %v2424_v51  ;;  %v2442_v50 = vld [vmem:[#allocation2 + $0xa0] sm:$0xff] }
 0x2a0   : > { %3486 = vst [vmem:[#allocation4 + $0x90] sm:$0xff] %v3402_v58   ;;  %v3412_v5 = vpack.c.bf16 %v2555_v60, %v2554_v59  ;;  %v2557_v6 = vmax.f32 %v2493_v61, 0.0  ;;  %v2496_v7 = vadd.f32 %v4444_v36, %v2425_v56  ;;  %v2497_v8 = vadd.f32 %v4444_v36, %v2426_v57 }
 0x2a1   : > { %3487 = vst [vmem:[#allocation4 + $0x98] sm:$0xff] %v3407_v0   ;;  %v2558_v10 = vmax.f32 %v2494_v2, 0.0  ;;  %v2559_v11 = vmax.f32 %v2495_v3, 0.0  ;;  %v2498_v12 = vadd.f32 %v4444_v36, %v2427_v62  ;;  %v2499_v13 = vadd.f32 %v4444_v36, %v2428_v63 }
 0x2a2   : > { %3488 = vst [vmem:[#allocation4 + $0xa0] sm:$0xff] %v3412_v5   ;;  %v3417_v16 = vpack.c.bf16 %v2557_v6, %v2556_v1  ;;  %v2560_v17 = vmax.f32 %v2496_v7, 0.0  ;;  %v2561_v18 = vmax.f32 %v2497_v8, 0.0  ;;  %v2500_v19 = vadd.f32 %v4444_v36, %v2429_v4 }
 0x2a3   : > { %v3422_v22 = vpack.c.bf16 %v2559_v11, %v2558_v10  ;;  %v2562_v23 = vmax.f32 %v2498_v12, 0.0  ;;  %v2563_v24 = vmax.f32 %v2499_v13, 0.0  ;;  %v2501_v25 = vadd.f32 %v4444_v36, %v2430_v9 }
 0x2a4   : > { %3489 = vst [vmem:[#allocation4 + $0xa8] sm:$0xff] %v3417_v16   ;;  %v3427_v28 = vpack.c.bf16 %v2561_v18, %v2560_v17  ;;  %v2564_v29 = vmax.f32 %v2500_v19, 0.0  ;;  %v2502_v30 = vadd.f32 %v4444_v36, %v2431_v14  ;;  %v2503_v31 = vadd.f32 %v4444_v36, %v2432_v15 }
 0x2a5   : > { %3490 = vst [vmem:[#allocation4 + $0xb0] sm:$0xff] %v3422_v22   ;;  %v3432_v33 = vpack.c.bf16 %v2563_v24, %v2562_v23  ;;  %v2565_v34 = vmax.f32 %v2501_v25, 0.0  ;;  %v2504_v35 = vadd.f32 %v4444_v36, %v2433_v20  ;;  %v2505_v37 = vadd.f32 %v4444_v36, %v2434_v21 }
 0x2a6   : > { %3491 = vst [vmem:[#allocation4 + $0xb8] sm:$0xff] %v3427_v28   ;;  %v2566_v39 = vmax.f32 %v2502_v30, 0.0  ;;  %v2567_v40 = vmax.f32 %v2503_v31, 0.0  ;;  %v2506_v41 = vadd.f32 %v4444_v36, %v2435_v26  ;;  %v2507_v42 = vadd.f32 %v4444_v36, %v2436_v27 }
 0x2a7   : > { %3492 = vst [vmem:[#allocation4 + $0xc0] sm:$0xff] %v3432_v33   ;;  %v3437_v45 = vpack.c.bf16 %v2565_v34, %v2564_v29  ;;  %v2568_v46 = vmax.f32 %v2504_v35, 0.0  ;;  %v2569_v47 = vmax.f32 %v2505_v37, 0.0  ;;  %v2508_v48 = vadd.f32 %v4444_v36, %v2437_v32 }
 0x2a8   : > { %v3442_v51 = vpack.c.bf16 %v2567_v40, %v2566_v39  ;;  %v2570_v52 = vmax.f32 %v2506_v41, 0.0  ;;  %v2571_v53 = vmax.f32 %v2507_v42, 0.0  ;;  %v2509_v54 = vadd.f32 %v4444_v36, %v2438_v38 }
 0x2a9   : > { %3493 = vst [vmem:[#allocation4 + $0xc8] sm:$0xff] %v3437_v45   ;;  %v3447_v55 = vpack.c.bf16 %v2569_v47, %v2568_v46  ;;  %v2572_v56 = vmax.f32 %v2508_v48, 0.0  ;;  %v2510_v57 = vadd.f32 %v4444_v36, %v2439_v43  ;;  %v2511_v58 = vadd.f32 %v4444_v36, %v2440_v44 }
 0x2aa   : > { %3494 = vst [vmem:[#allocation4 + $0xd0] sm:$0xff] %v3442_v51   ;;  %v3452_v59 = vpack.c.bf16 %v2571_v53, %v2570_v52  ;;  %v2573_v60 = vmax.f32 %v2509_v54, 0.0  ;;  %v2512_v61 = vadd.f32 %v4444_v36, %v2441_v49  ;;  %v2513_v62 = vadd.f32 %v4444_v36, %v2442_v50 }
 0x2ab   : > { %3495 = vst [vmem:[#allocation4 + $0xd8] sm:$0xff] %v3447_v55   ;;  %v2574_v63 = vmax.f32 %v2510_v57, 0.0  ;;  %v2575_v0 = vmax.f32 %v2511_v58, 0.0 }
 0x2ac   : > { %3496 = vst [vmem:[#allocation4 + $0xe0] sm:$0xff] %v3452_v59   ;;  %v3457_v1 = vpack.c.bf16 %v2573_v60, %v2572_v56  ;;  %v2576_v2 = vmax.f32 %v2512_v61, 0.0  ;;  %v2577_v3 = vmax.f32 %v2513_v62, 0.0 }
 0x2ad   : > { %v3462_v4 = vpack.c.bf16 %v2575_v0, %v2574_v63 }
 0x2ae   : > { %3497 = vst [vmem:[#allocation4 + $0xe8] sm:$0xff] %v3457_v1   ;;  %v3467_v5 = vpack.c.bf16 %v2577_v3, %v2576_v2 }
 0x2af   : > { %3498 = vst [vmem:[#allocation4 + $0xf0] sm:$0xff] %v3462_v4  }
 0x2b0   : > { %3499 = vst [vmem:[#allocation4 + $0xf8] sm:$0xff] %v3467_v5  }
 0x2b1 PF: > { %p4512_p12 = scmp.eq.s32.totalorder %s3002_s17, 1  ;;  %s3845_s14 = smov [#allocation4]  }
 0x2b2   : > { %s2908_s19 = sshll.u32 %s3845_s14, 4  ;;  %s2909_s19 = int_to_ptr.vmem [resolvable:$true] %s2908_s19 }
 0x2b3   : > { %s3775_s20 = scalar_lea.vmem %s2909_s19, 4096  ;;  %p3782_p2 = scmp.lt.s32.totalorder %s2909_s19, %s2909_s19 }
 0x2b4   : > { %p3776_p13 = scmp.ne.s32.totalorder %s2909_s19, %s3775_s20  ;;  %p3783_p3 = scmp.lt.s32.totalorder %s3775_s20, %s3775_s20 }
 0x2b6   : > { %p3777_p0 = pnand %p3776_p13, %p4512_p12  ;;  %p3784_p4 = por %p3783_p3, %p3782_p2 }
 0x2b8   : > { %p3778_p1 = pneg %p3777_p0 }
 0x2ba   : > { %p3785_p5 = pnand %p3784_p4, %p3778_p1 }
 0x2bc   : > { %3788 = shalt.err (!%p3785_p5)
}
 0x2bd   : > { %s3846_s22 = smov 64   ;;  %s3847_s17 = smov 4  }
 0x2be   : > { %3501 = dma.vmem_to_hbm [thread:$0]  (%p4512_p12), %s2909_s19, 4096, %s4545_s3, [#allocation5], %s3846_s22, %s3846_s22, %s3847_s17  }
 0x2bf   : > { %3820 = dma.done.wait (%p4512_p12), [#allocation5], 4096  }
 0x2c0   : > { %3822 = vsyncadd (%p4512_p12), [#allocation5], 4294963200 }
 0x2c1 PF: > { %s14_s16 = sadd.s32 1, %s3841_s16   ;;  %s4547_s12 = smov %s3829_s13 }
 0x2c2   : > { %p11_p6 = scmp.ge.s32.totalorder %s14_s16, 4   ;;  %s4548_s13 = smov %s3904_s21 }
 0x2c3   : > { %s4549_s14 = smov %s3837_s15  ;;  %s4550_s15 = smov %s4552_s18 }
 0x2c4   :  { %13 = sbr.rel (!%p11_p6) target bundleno = 3 (0x3), region = 102 }
 0x2c9   :  { %2924 = vsyncpa [#allocation5], 1 }
 0x2ca   :  { %2926 = vsyncpa [#allocation5 + $0x1], 1 }

</bundles_post_ra>
